<compile_context>
chip_gen: v6e
topology: v6e:2x2x1
jax: 0.10.0
libtpu: 0.0.40
codegen_flags: <defaults>
</compile_context>

<pallas_src>
import math
import functools

import jax
import jax.numpy as jnp
from jax.experimental import pallas as pl
from jax.experimental.pallas import tpu as pltpu

# ----------------------------- configuration -------------------------------
MAX_TOKENS = 7                      # -> context_window = 8
NUSER, NITEM, NTOKEN = 16, 16, 64
EMSIZE, NHEAD, NHID, NLAYERS = 32, 2, 64, 2
PAD_IDX = 0
ALWAYS_VISIBLE = 2                  # recommender_usage == 'regularizer'
BATCH = 2
TEXT_SIZE = 8                       # <= context_window
LN_EPS = 1e-5
NEG_INF = -1e30
LP_PAD = 128                        # lane-dense width of the fused output slab
SEQ = ALWAYS_VISIBLE + TEXT_SIZE    # 10
NROWS = BATCH * SEQ                 # 20

# output slab layout: [log_softmax (V) | rating (1) | attn layer 0..L-1 (B*S each) | 0-pad]
assert NTOKEN + 1 + NLAYERS * NROWS <= LP_PAD

# TODO(synk): dropout (pos_encoder / encoder layers) is identity (eval mode);
# the BERT pretrained-embedding loading path is not reproduced (synthetic init).


# ----------------------------- Pallas kernel --------------------------------
def _layernorm(x, g, b):
    mu = jnp.mean(x, axis=-1, keepdims=True)
    var = jnp.mean((x - mu) ** 2, axis=-1, keepdims=True)
    return (x - mu) * jax.lax.rsqrt(var + LN_EPS) * g + b


def _peter_fused_kernel(x_ref, mask_ref,
                        wqkv_ref, bqkv_ref, wo_ref, vece_ref,
                        w1_ref, b1_ref, w2_ref,
                        head_w_ref, head_b_ref, mw2_ref, mb2_ref,
                        out_ref, *, nlayers, nhead, ntoken):
    """Whole PETER forward in a single invocation (no grid).

    x_ref:      (B*S, E)      embedded + scaled + pos-encoded source (row = b*S+s)
    mask_ref:   (B*S, B*S)    block-diagonal additive attention mask (0 / NEG_INF)
    wqkv_ref:   (L, E, 3E)    packed Wq|Wk|Wv        bqkv_ref: (L, 1, 3E)
    wo_ref:     (L, E, E)
    vece_ref:   (L, 6, E)     rows = [bo, ln1_g, ln1_b, b2, ln2_g, ln2_b]
    w1_ref:     (L, E, H)     b1_ref: (L, 1, H)      w2_ref:   (L, H, E)
    head_w_ref: (E, V+E)      packed hidden2token | MLP-layer-1 weights
    head_b_ref: (1, V+E)      packed biases
    mw2_ref:    (E, 1)        mb2_ref: (1, 1)        MLP rating output layer
    out_ref:    (B*S, LP_PAD) lane-dense slab (see layout above)
    """
    N, E = x_ref.shape
    D = E // nhead
    scale = 1.0 / math.sqrt(D)

    x = x_ref[...].astype(jnp.float32)              # (N, E)
    mask = mask_ref[...].astype(jnp.float32)        # (N, N)

    attn_layers = []
    for l in range(nlayers):                        # static unroll over layers
        vec = vece_ref[l]                           # (6, E)
        bo, ln1g, ln1b = vec[0:1, :], vec[1:2, :], vec[2:3, :]
        b2, ln2g, ln2b = vec[3:4, :], vec[4:5, :], vec[5:6, :]

        # one packed QKV MXU pass over ALL batch rows: (N, E) x (E, 3E)
        qkv = jnp.dot(x, wqkv_ref[l],
                      preferred_element_type=jnp.float32) + bqkv_ref[l]

        attn_sum = jnp.zeros((N, N), jnp.float32)
        head_outs = []
        for h in range(nhead):                      # static unroll over heads
            qh = qkv[:, h * D:(h + 1) * D] * scale
            kh = qkv[:, E + h * D:E + (h + 1) * D]
            vh = qkv[:, 2 * E + h * D:2 * E + (h + 1) * D]
            s = jax.lax.dot_general(qh, kh, (((1,), (1,)), ((), ())),
                                    preferred_element_type=jnp.float32)
            s = s + mask                            # block-diag mask kills x-batch
            m = jnp.max(s, axis=-1, keepdims=True)
            p = jnp.exp(s - m)
            # EUP reciprocal instead of a VALU divide
            p = p * pl.reciprocal(jnp.sum(p, axis=-1, keepdims=True),
                                  approx=True)
            attn_sum = attn_sum + p
            head_outs.append(jnp.dot(p, vh,
                                     preferred_element_type=jnp.float32))

        attn_layers.append(attn_sum * (1.0 / nhead))   # torch MHA head-average

        ctx = jnp.concatenate(head_outs, axis=-1)   # (N, E)
        o = jnp.dot(ctx, wo_ref[l], preferred_element_type=jnp.float32) + bo
        h1 = _layernorm(x + o, ln1g, ln1b)
        f = jnp.dot(h1, w1_ref[l], preferred_element_type=jnp.float32) + b1_ref[l]
        f = jnp.maximum(f, 0.0)                     # ReLU
        f = jnp.dot(f, w2_ref[l], preferred_element_type=jnp.float32) + b2
        x = _layernorm(h1 + f, ln2g, ln2b)

    # Fused hidden2token + MLP first layer: ONE tall matmul over all positions.
    head = jnp.dot(x, head_w_ref[...],
                   preferred_element_type=jnp.float32) + head_b_ref[...]   # (N, V+E)
    logits = head[:, :ntoken]
    m = jnp.max(logits, axis=-1, keepdims=True)
    lse = m + jnp.log(jnp.sum(jnp.exp(logits - m), axis=-1, keepdims=True))
    logprob = logits - lse                                                  # (N, V)

    hm = jax.nn.sigmoid(head[:, ntoken:])                                   # (N, E)
    rating = jnp.dot(hm, mw2_ref[...],
                     preferred_element_type=jnp.float32) + mb2_ref[...]     # (N, 1)

    # Single lane-dense store:
    #   [log-probs | rating | attn(layer 0) | attn(layer 1) | zero pad]
    pad = LP_PAD - ntoken - 1 - nlayers * N
    out_ref[...] = jnp.concatenate(
        [logprob, rating] + attn_layers + [jnp.zeros((N, pad), jnp.float32)],
        axis=-1)


# ----------------------------- kernel wrapper --------------------------------
def peter_fused(x_flat, mask_big, p):
    """x_flat: (B*S, E) f32, mask_big: (B*S, B*S) f32 block-diag additive mask.
    One grid-less pallas_call for the whole forward.
    Returns the lane-dense (B*S, LP_PAD) heads/attention slab."""
    N = x_flat.shape[0]
    vm = lambda: pl.BlockSpec(memory_space=pltpu.MemorySpace.VMEM)
    inputs = (x_flat, mask_big,
              p['wqkv'], p['bqkv'], p['wo'], p['vecE'],
              p['w1'], p['b1'], p['w2'],
              p['head_w'], p['head_b'], p['mlp_w2'], p['mlp_b2'])
    return pl.pallas_call(
        functools.partial(_peter_fused_kernel,
                          nlayers=NLAYERS, nhead=NHEAD, ntoken=NTOKEN),
        out_shape=jax.ShapeDtypeStruct((N, LP_PAD), jnp.float32),
        in_specs=[vm() for _ in inputs],
        out_specs=vm(),
    )(*inputs)


# ----------------------------- glue (plain JAX) -----------------------------
def positional_encoding(seq_len, emsize):
    pos = jnp.arange(seq_len, dtype=jnp.float32)[:, None]
    div = jnp.exp(jnp.arange(0, emsize, 2, dtype=jnp.float32)
                  * (-math.log(10000.0) / emsize))
    pe = jnp.zeros((seq_len, emsize), jnp.float32)
    pe = pe.at[:, 0::2].set(jnp.sin(pos * div))
    pe = pe.at[:, 1::2].set(jnp.cos(pos * div))
    return pe                                          # (S, E)


def generate_andreu_mask(always_visible, context_window):
    size = always_visible + context_window
    mask = jnp.full((size, size), True)
    mask = mask.at[:, :always_visible].set(False)
    causal = ~jnp.tril(jnp.ones((context_window, context_window), bool))
    mask = mask.at[always_visible:, always_visible:].set(causal)
    return mask                                        # True == masked


def peter_forward(params, user, item, text):
    """Mirrors PETER.forward(user, item, rating=None, text, mode='parallel')
    with recommender_usage='regularizer', recommender_source='transformer'."""
    B = user.shape[0]
    T = text.shape[0]
    S = ALWAYS_VISIBLE + T

    user_embed = params['user_emb'][user]              # (B, E)
    item_embed = params['item_emb'][item]              # (B, E)
    text_embed = params['token_emb'][text]             # (T, B, E)

    src = jnp.concatenate([user_embed[None], item_embed[None], text_embed], 0)  # (S, B, E)
    src = src * math.sqrt(EMSIZE)
    src = src + positional_encoding(S, EMSIZE)[:, None, :]

    attn_mask = generate_andreu_mask(ALWAYS_VISIBLE, MAX_TOKENS + 1)[:S, :S]    # (S, S) bool
    key_padding = jnp.concatenate(
        [jnp.zeros((B, ALWAYS_VISIBLE), bool), (text.T == PAD_IDX)], axis=1)    # (B, S)
    combined = attn_mask[None, :, :] | key_padding[:, None, :]
    mask_add = jnp.where(combined, NEG_INF, 0.0).astype(jnp.float32)            # (B, S, S)

    # Block-diagonal (B*S, B*S) additive mask: different batch rows never attend
    # to each other, which lets the kernel fold the batch into the row axis.
    mask_big = jnp.full((B * S, B * S), NEG_INF, jnp.float32)
    for b in range(B):
        mask_big = mask_big.at[b * S:(b + 1) * S, b * S:(b + 1) * S].set(mask_add[b])

    x_flat = jnp.transpose(src, (1, 0, 2)).reshape(B * S, EMSIZE).astype(jnp.float32)

    heads = peter_fused(x_flat, mask_big, params['fused'])   # (B*S, LP_PAD)

    lp = heads[:, :NTOKEN].reshape(B, S, NTOKEN)
    log_context_dis = lp[:, 1, :]                                        # hidden[1] -> (B, V)
    log_token_prob = jnp.transpose(lp[:, ALWAYS_VISIBLE:, :], (1, 0, 2)) # (T, B, V)
    predicted_rating = heads[:, NTOKEN].reshape(B, S)[:, 0]              # hidden[0] -> (B,)

    attn_list = []
    off = NTOKEN + 1
    for l in range(NLAYERS):
        a = heads[:, off + l * B * S: off + (l + 1) * B * S].reshape(B, S, B, S)
        attn_list.append(a[jnp.arange(B), :, jnp.arange(B), :])          # diag blocks (B,S,S)
    attns = jnp.stack(attn_list)                                         # (L, B, S, S)

    return log_token_prob, log_context_dis, predicted_rating, attns


# ----------------------------- parameter init -------------------------------
def _uni(key, shape, scale):
    return jax.random.uniform(key, shape, jnp.float32, -scale, scale)


def init_layer_params(key):
    ks = jax.random.split(key, 6)
    s = 1.0 / math.sqrt(EMSIZE)
    return dict(
        wq=_uni(ks[0], (EMSIZE, EMSIZE), s), bq=jnp.zeros((1, EMSIZE), jnp.float32),
        wk=_uni(ks[1], (EMSIZE, EMSIZE), s), bk=jnp.zeros((1, EMSIZE), jnp.float32),
        wv=_uni(ks[2], (EMSIZE, EMSIZE), s), bv=jnp.zeros((1, EMSIZE), jnp.float32),
        wo=_uni(ks[3], (EMSIZE, EMSIZE), s), bo=jnp.zeros((1, EMSIZE), jnp.float32),
        ln1_g=jnp.ones((1, EMSIZE), jnp.float32), ln1_b=jnp.zeros((1, EMSIZE), jnp.float32),
        w1=_uni(ks[4], (EMSIZE, NHID), s), b1=jnp.zeros((1, NHID), jnp.float32),
        w2=_uni(ks[5], (NHID, EMSIZE), 1.0 / math.sqrt(NHID)),
        b2=jnp.zeros((1, EMSIZE), jnp.float32),
        ln2_g=jnp.ones((1, EMSIZE), jnp.float32), ln2_b=jnp.zeros((1, EMSIZE), jnp.float32),
    )


def pack_layers(layers):
    """Stack per-layer params on a leading L axis, packing QKV and E-wide vecs."""
    return dict(
        wqkv=jnp.stack([jnp.concatenate([lp['wq'], lp['wk'], lp['wv']], 1)
                        for lp in layers]),                               # (L, E, 3E)
        bqkv=jnp.stack([jnp.concatenate([lp['bq'], lp['bk'], lp['bv']], 1)
                        for lp in layers]),                               # (L, 1, 3E)
        wo=jnp.stack([lp['wo'] for lp in layers]),                        # (L, E, E)
        vecE=jnp.stack([jnp.concatenate([lp['bo'], lp['ln1_g'], lp['ln1_b'],
                                         lp['b2'], lp['ln2_g'], lp['ln2_b']], 0)
                        for lp in layers]),                               # (L, 6, E)
        w1=jnp.stack([lp['w1'] for lp in layers]),                        # (L, E, H)
        b1=jnp.stack([lp['b1'] for lp in layers]),                        # (L, 1, H)
        w2=jnp.stack([lp['w2'] for lp in layers]),                        # (L, H, E)
    )


def init_params(key):
    keys = jax.random.split(key, 6 + NLAYERS)
    layers = [init_layer_params(keys[6 + l]) for l in range(NLAYERS)]
    fused = pack_layers(layers)

    h2t_w = _uni(keys[3], (EMSIZE, NTOKEN), 0.1)       # Linear weight, stored (E, V)
    h2t_b = jnp.zeros((1, NTOKEN), jnp.float32)
    mlp_w1 = _uni(keys[4], (EMSIZE, EMSIZE), 1.0 / math.sqrt(EMSIZE))
    mlp_b1 = jnp.zeros((1, EMSIZE), jnp.float32)

    fused.update(
        head_w=jnp.concatenate([h2t_w, mlp_w1], axis=1),       # (E, V+E) packed
        head_b=jnp.concatenate([h2t_b, mlp_b1], axis=1),       # (1, V+E)
        mlp_w2=_uni(keys[5], (EMSIZE, 1), 1.0 / math.sqrt(EMSIZE)),
        mlp_b2=jnp.zeros((1, 1), jnp.float32),
    )
    return dict(
        user_emb=_uni(keys[0], (NUSER, EMSIZE), 0.1),
        item_emb=_uni(keys[1], (NITEM, EMSIZE), 0.1),
        token_emb=_uni(keys[2], (NTOKEN, EMSIZE), 0.1),
        fused=fused,
    )


# ------------------------------------ main ----------------------------------
if __name__ == "__main__":
    params = init_params(jax.random.PRNGKey(0))

    key = jax.random.PRNGKey(0)
    ku, ki, kt = jax.random.split(key, 3)
    user = jax.random.randint(ku, (BATCH,), 0, NUSER, dtype=jnp.int32)
    item = jax.random.randint(ki, (BATCH,), 0, NITEM, dtype=jnp.int32)
    text = jax.random.randint(kt, (TEXT_SIZE, BATCH), 1, NTOKEN, dtype=jnp.int32)
    text = text.at[-1, 0].set(PAD_IDX)                 # exercise key_padding_mask

    fwd = jax.jit(peter_forward)
    log_token_prob, log_context_dis, predicted_rating, attns = fwd(
        params, user, item, text)
    jax.block_until_ready((log_token_prob, log_context_dis, predicted_rating, attns))

    S = ALWAYS_VISIBLE + TEXT_SIZE
    assert log_token_prob.shape == (TEXT_SIZE, BATCH, NTOKEN)
    assert log_context_dis.shape == (BATCH, NTOKEN)
    assert predicted_rating.shape == (BATCH,)
    assert attns.shape == (NLAYERS, BATCH, S, S)
    # log_softmax rows must sum to ~1 in prob space
    assert jnp.allclose(jnp.exp(log_context_dis).sum(-1), 1.0, atol=1e-3)
    # attention rows must sum to ~1 (softmax averaged over heads)
    assert jnp.allclose(attns.sum(-1), 1.0, atol=1e-2)
    assert bool(jnp.all(jnp.isfinite(log_token_prob)))
    assert bool(jnp.all(jnp.isfinite(predicted_rating)))

    print("KERNEL_OK")
</pallas_src>

<mosaic_0001>
module attributes {stable_mosaic.version = 11 : i64} {
  func.func @_peter_fused_kernel(%arg0: memref<20x32xf32, #tpu.memory_space<vmem>>, %arg1: memref<20x20xf32, #tpu.memory_space<vmem>>, %arg2: memref<2x32x96xf32, #tpu.memory_space<vmem>>, %arg3: memref<2x1x96xf32, #tpu.memory_space<vmem>>, %arg4: memref<2x32x32xf32, #tpu.memory_space<vmem>>, %arg5: memref<2x6x32xf32, #tpu.memory_space<vmem>>, %arg6: memref<2x32x64xf32, #tpu.memory_space<vmem>>, %arg7: memref<2x1x64xf32, #tpu.memory_space<vmem>>, %arg8: memref<2x64x32xf32, #tpu.memory_space<vmem>>, %arg9: memref<32x96xf32, #tpu.memory_space<vmem>>, %arg10: memref<1x96xf32, #tpu.memory_space<vmem>>, %arg11: memref<32x1xf32, #tpu.memory_space<vmem>>, %arg12: memref<1x1xf32, #tpu.memory_space<vmem>>, %arg13: memref<20x128xf32, #tpu.memory_space<vmem>>) attributes {dimension_semantics = [], scalar_prefetch = 0 : i64, scratch_operands = 0 : i64, tpu.core_type = #tpu.core_type<tc>} {
    %c0 = arith.constant 0 : index
    %c0_0 = arith.constant 0 : index
    %0 = vector.load %arg0[%c0, %c0_0] : memref<20x32xf32, #tpu.memory_space<vmem>>, vector<20x32xf32>
    %c0_1 = arith.constant 0 : index
    %c0_2 = arith.constant 0 : index
    %1 = vector.load %arg1[%c0_1, %c0_2] : memref<20x20xf32, #tpu.memory_space<vmem>>, vector<20x20xf32>
    %c0_3 = arith.constant 0 : index
    %c0_4 = arith.constant 0 : index
    %c0_5 = arith.constant 0 : index
    %2 = vector.load %arg5[%c0_3, %c0_4, %c0_5] : memref<2x6x32xf32, #tpu.memory_space<vmem>>, vector<1x6x32xf32>
    %3 = vector.shape_cast %2 : vector<1x6x32xf32> to vector<6x32xf32>
    %4 = vector.extract_strided_slice %3 {offsets = [0, 0], sizes = [1, 32], strides = [1, 1]} : vector<6x32xf32> to vector<1x32xf32>
    %5 = vector.extract_strided_slice %3 {offsets = [1, 0], sizes = [1, 32], strides = [1, 1]} : vector<6x32xf32> to vector<1x32xf32>
    %6 = vector.extract_strided_slice %3 {offsets = [2, 0], sizes = [1, 32], strides = [1, 1]} : vector<6x32xf32> to vector<1x32xf32>
    %7 = vector.extract_strided_slice %3 {offsets = [3, 0], sizes = [1, 32], strides = [1, 1]} : vector<6x32xf32> to vector<1x32xf32>
    %8 = vector.extract_strided_slice %3 {offsets = [4, 0], sizes = [1, 32], strides = [1, 1]} : vector<6x32xf32> to vector<1x32xf32>
    %9 = vector.extract_strided_slice %3 {offsets = [5, 0], sizes = [1, 32], strides = [1, 1]} : vector<6x32xf32> to vector<1x32xf32>
    %c0_6 = arith.constant 0 : index
    %c0_7 = arith.constant 0 : index
    %c0_8 = arith.constant 0 : index
    %10 = vector.load %arg2[%c0_6, %c0_7, %c0_8] : memref<2x32x96xf32, #tpu.memory_space<vmem>>, vector<1x32x96xf32>
    %11 = vector.shape_cast %10 : vector<1x32x96xf32> to vector<32x96xf32>
    %cst = arith.constant dense<0.000000e+00> : vector<20x96xf32>
    %12 = tpu.matmul %0, %11, %cst {dimension_numbers = #tpu.dot_dimension_numbers<[1], [0], [0], [1], [0, 0, 1, 1], [], []>} : vector<20x32xf32>, vector<32x96xf32>, vector<20x96xf32> -> vector<20x96xf32>
    %c0_9 = arith.constant 0 : index
    %c0_10 = arith.constant 0 : index
    %c0_11 = arith.constant 0 : index
    %13 = vector.load %arg3[%c0_9, %c0_10, %c0_11] : memref<2x1x96xf32, #tpu.memory_space<vmem>>, vector<1x1x96xf32>
    %14 = vector.shape_cast %13 : vector<1x1x96xf32> to vector<1x96xf32>
    %15 = vector.broadcast %14 : vector<1x96xf32> to vector<20x96xf32>
    %16 = arith.addf %12, %15 : vector<20x96xf32>
    %cst_12 = arith.constant 0.000000e+00 : f32
    %17 = vector.broadcast %cst_12 : f32 to vector<20x20xf32>
    %18 = vector.extract_strided_slice %16 {offsets = [0, 0], sizes = [20, 16], strides = [1, 1]} : vector<20x96xf32> to vector<20x16xf32>
    %cst_13 = arith.constant 2.500000e-01 : f32
    %19 = vector.broadcast %cst_13 : f32 to vector<20x16xf32>
    %20 = arith.mulf %18, %19 : vector<20x16xf32>
    %21 = vector.extract_strided_slice %16 {offsets = [0, 32], sizes = [20, 16], strides = [1, 1]} : vector<20x96xf32> to vector<20x16xf32>
    %22 = vector.extract_strided_slice %16 {offsets = [0, 64], sizes = [20, 16], strides = [1, 1]} : vector<20x96xf32> to vector<20x16xf32>
    %cst_14 = arith.constant dense<0.000000e+00> : vector<20x20xf32>
    %23 = tpu.matmul %20, %21, %cst_14 {dimension_numbers = #tpu.dot_dimension_numbers<[1], [1], [0], [0], [0, 0, 1, 0], [], []>} : vector<20x16xf32>, vector<20x16xf32>, vector<20x20xf32> -> vector<20x20xf32>
    %24 = arith.addf %23, %1 : vector<20x20xf32>
    %cst_15 = arith.constant dense<0xFF800000> : vector<20xf32>
    %25 = vector.multi_reduction <maximumf>, %24, %cst_15 [1] : vector<20x20xf32> to vector<20xf32>
    %26 = vector.shape_cast %25 : vector<20xf32> to vector<20x1xf32>
    %27 = vector.broadcast %26 : vector<20x1xf32> to vector<20x20xf32>
    %28 = arith.subf %24, %27 : vector<20x20xf32>
    %29 = math.exp %28 : vector<20x20xf32>
    %cst_16 = arith.constant dense<0.000000e+00> : vector<20xf32>
    %30 = vector.multi_reduction <add>, %29, %cst_16 [1] : vector<20x20xf32> to vector<20xf32>
    %31 = vector.shape_cast %30 : vector<20xf32> to vector<20x1xf32>
    %32 = tpu.reciprocal %31 {approx = true} : vector<20x1xf32> -> vector<20x1xf32>
    %33 = vector.broadcast %32 : vector<20x1xf32> to vector<20x20xf32>
    %34 = arith.mulf %29, %33 : vector<20x20xf32>
    %35 = arith.addf %17, %34 : vector<20x20xf32>
    %cst_17 = arith.constant dense<0.000000e+00> : vector<20x16xf32>
    %36 = tpu.matmul %34, %22, %cst_17 {dimension_numbers = #tpu.dot_dimension_numbers<[1], [0], [0], [1], [0, 0, 1, 1], [], []>} : vector<20x20xf32>, vector<20x16xf32>, vector<20x16xf32> -> vector<20x16xf32>
    %37 = vector.extract_strided_slice %16 {offsets = [0, 16], sizes = [20, 16], strides = [1, 1]} : vector<20x96xf32> to vector<20x16xf32>
    %cst_18 = arith.constant 2.500000e-01 : f32
    %38 = vector.broadcast %cst_18 : f32 to vector<20x16xf32>
    %39 = arith.mulf %37, %38 : vector<20x16xf32>
    %40 = vector.extract_strided_slice %16 {offsets = [0, 48], sizes = [20, 16], strides = [1, 1]} : vector<20x96xf32> to vector<20x16xf32>
    %41 = vector.extract_strided_slice %16 {offsets = [0, 80], sizes = [20, 16], strides = [1, 1]} : vector<20x96xf32> to vector<20x16xf32>
    %cst_19 = arith.constant dense<0.000000e+00> : vector<20x20xf32>
    %42 = tpu.matmul %39, %40, %cst_19 {dimension_numbers = #tpu.dot_dimension_numbers<[1], [1], [0], [0], [0, 0, 1, 0], [], []>} : vector<20x16xf32>, vector<20x16xf32>, vector<20x20xf32> -> vector<20x20xf32>
    %43 = arith.addf %42, %1 : vector<20x20xf32>
    %cst_20 = arith.constant dense<0xFF800000> : vector<20xf32>
    %44 = vector.multi_reduction <maximumf>, %43, %cst_20 [1] : vector<20x20xf32> to vector<20xf32>
    %45 = vector.shape_cast %44 : vector<20xf32> to vector<20x1xf32>
    %46 = vector.broadcast %45 : vector<20x1xf32> to vector<20x20xf32>
    %47 = arith.subf %43, %46 : vector<20x20xf32>
    %48 = math.exp %47 : vector<20x20xf32>
    %cst_21 = arith.constant dense<0.000000e+00> : vector<20xf32>
    %49 = vector.multi_reduction <add>, %48, %cst_21 [1] : vector<20x20xf32> to vector<20xf32>
    %50 = vector.shape_cast %49 : vector<20xf32> to vector<20x1xf32>
    %51 = tpu.reciprocal %50 {approx = true} : vector<20x1xf32> -> vector<20x1xf32>
    %52 = vector.broadcast %51 : vector<20x1xf32> to vector<20x20xf32>
    %53 = arith.mulf %48, %52 : vector<20x20xf32>
    %54 = arith.addf %35, %53 : vector<20x20xf32>
    %cst_22 = arith.constant dense<0.000000e+00> : vector<20x16xf32>
    %55 = tpu.matmul %53, %41, %cst_22 {dimension_numbers = #tpu.dot_dimension_numbers<[1], [0], [0], [1], [0, 0, 1, 1], [], []>} : vector<20x20xf32>, vector<20x16xf32>, vector<20x16xf32> -> vector<20x16xf32>
    %cst_23 = arith.constant 5.000000e-01 : f32
    %56 = vector.broadcast %cst_23 : f32 to vector<20x20xf32>
    %57 = arith.mulf %54, %56 : vector<20x20xf32>
    %58 = tpu.concatenate %36, %55 in 1 : vector<20x16xf32>, vector<20x16xf32> -> vector<20x32xf32>
    %c0_24 = arith.constant 0 : index
    %c0_25 = arith.constant 0 : index
    %c0_26 = arith.constant 0 : index
    %59 = vector.load %arg4[%c0_24, %c0_25, %c0_26] : memref<2x32x32xf32, #tpu.memory_space<vmem>>, vector<1x32x32xf32>
    %60 = vector.shape_cast %59 : vector<1x32x32xf32> to vector<32x32xf32>
    %cst_27 = arith.constant dense<0.000000e+00> : vector<20x32xf32>
    %61 = tpu.matmul %58, %60, %cst_27 {dimension_numbers = #tpu.dot_dimension_numbers<[1], [0], [0], [1], [0, 0, 1, 1], [], []>} : vector<20x32xf32>, vector<32x32xf32>, vector<20x32xf32> -> vector<20x32xf32>
    %62 = vector.broadcast %4 : vector<1x32xf32> to vector<20x32xf32>
    %63 = arith.addf %61, %62 : vector<20x32xf32>
    %64 = arith.addf %0, %63 : vector<20x32xf32>
    %cst_28 = arith.constant dense<0.000000e+00> : vector<20xf32>
    %65 = vector.multi_reduction <add>, %64, %cst_28 [1] : vector<20x32xf32> to vector<20xf32>
    %66 = vector.shape_cast %65 : vector<20xf32> to vector<20x1xf32>
    %cst_29 = arith.constant 3.200000e+01 : f32
    %67 = vector.broadcast %cst_29 : f32 to vector<20x1xf32>
    %68 = arith.divf %66, %67 : vector<20x1xf32>
    %69 = vector.broadcast %68 : vector<20x1xf32> to vector<20x32xf32>
    %70 = arith.subf %64, %69 : vector<20x32xf32>
    %71 = arith.mulf %70, %70 : vector<20x32xf32>
    %cst_30 = arith.constant dense<0.000000e+00> : vector<20xf32>
    %72 = vector.multi_reduction <add>, %71, %cst_30 [1] : vector<20x32xf32> to vector<20xf32>
    %73 = vector.shape_cast %72 : vector<20xf32> to vector<20x1xf32>
    %cst_31 = arith.constant 3.200000e+01 : f32
    %74 = vector.broadcast %cst_31 : f32 to vector<20x1xf32>
    %75 = arith.divf %73, %74 : vector<20x1xf32>
    %76 = vector.broadcast %68 : vector<20x1xf32> to vector<20x32xf32>
    %77 = arith.subf %64, %76 : vector<20x32xf32>
    %cst_32 = arith.constant 9.99999974E-6 : f32
    %78 = vector.broadcast %cst_32 : f32 to vector<20x1xf32>
    %79 = arith.addf %75, %78 : vector<20x1xf32>
    %80 = math.rsqrt %79 : vector<20x1xf32>
    %81 = vector.broadcast %80 : vector<20x1xf32> to vector<20x32xf32>
    %82 = arith.mulf %77, %81 : vector<20x32xf32>
    %83 = vector.broadcast %5 : vector<1x32xf32> to vector<20x32xf32>
    %84 = arith.mulf %82, %83 : vector<20x32xf32>
    %85 = vector.broadcast %6 : vector<1x32xf32> to vector<20x32xf32>
    %86 = arith.addf %84, %85 : vector<20x32xf32>
    %c0_33 = arith.constant 0 : index
    %c0_34 = arith.constant 0 : index
    %c0_35 = arith.constant 0 : index
    %87 = vector.load %arg6[%c0_33, %c0_34, %c0_35] : memref<2x32x64xf32, #tpu.memory_space<vmem>>, vector<1x32x64xf32>
    %88 = vector.shape_cast %87 : vector<1x32x64xf32> to vector<32x64xf32>
    %cst_36 = arith.constant dense<0.000000e+00> : vector<20x64xf32>
    %89 = tpu.matmul %86, %88, %cst_36 {dimension_numbers = #tpu.dot_dimension_numbers<[1], [0], [0], [1], [0, 0, 1, 1], [], []>} : vector<20x32xf32>, vector<32x64xf32>, vector<20x64xf32> -> vector<20x64xf32>
    %c0_37 = arith.constant 0 : index
    %c0_38 = arith.constant 0 : index
    %c0_39 = arith.constant 0 : index
    %90 = vector.load %arg7[%c0_37, %c0_38, %c0_39] : memref<2x1x64xf32, #tpu.memory_space<vmem>>, vector<1x1x64xf32>
    %91 = vector.shape_cast %90 : vector<1x1x64xf32> to vector<1x64xf32>
    %92 = vector.broadcast %91 : vector<1x64xf32> to vector<20x64xf32>
    %93 = arith.addf %89, %92 : vector<20x64xf32>
    %cst_40 = arith.constant 0.000000e+00 : f32
    %94 = vector.broadcast %cst_40 : f32 to vector<20x64xf32>
    %95 = arith.maximumf %93, %94 : vector<20x64xf32>
    %c0_41 = arith.constant 0 : index
    %c0_42 = arith.constant 0 : index
    %c0_43 = arith.constant 0 : index
    %96 = vector.load %arg8[%c0_41, %c0_42, %c0_43] : memref<2x64x32xf32, #tpu.memory_space<vmem>>, vector<1x64x32xf32>
    %97 = vector.shape_cast %96 : vector<1x64x32xf32> to vector<64x32xf32>
    %cst_44 = arith.constant dense<0.000000e+00> : vector<20x32xf32>
    %98 = tpu.matmul %95, %97, %cst_44 {dimension_numbers = #tpu.dot_dimension_numbers<[1], [0], [0], [1], [0, 0, 1, 1], [], []>} : vector<20x64xf32>, vector<64x32xf32>, vector<20x32xf32> -> vector<20x32xf32>
    %99 = vector.broadcast %7 : vector<1x32xf32> to vector<20x32xf32>
    %100 = arith.addf %98, %99 : vector<20x32xf32>
    %101 = arith.addf %86, %100 : vector<20x32xf32>
    %cst_45 = arith.constant dense<0.000000e+00> : vector<20xf32>
    %102 = vector.multi_reduction <add>, %101, %cst_45 [1] : vector<20x32xf32> to vector<20xf32>
    %103 = vector.shape_cast %102 : vector<20xf32> to vector<20x1xf32>
    %cst_46 = arith.constant 3.200000e+01 : f32
    %104 = vector.broadcast %cst_46 : f32 to vector<20x1xf32>
    %105 = arith.divf %103, %104 : vector<20x1xf32>
    %106 = vector.broadcast %105 : vector<20x1xf32> to vector<20x32xf32>
    %107 = arith.subf %101, %106 : vector<20x32xf32>
    %108 = arith.mulf %107, %107 : vector<20x32xf32>
    %cst_47 = arith.constant dense<0.000000e+00> : vector<20xf32>
    %109 = vector.multi_reduction <add>, %108, %cst_47 [1] : vector<20x32xf32> to vector<20xf32>
    %110 = vector.shape_cast %109 : vector<20xf32> to vector<20x1xf32>
    %cst_48 = arith.constant 3.200000e+01 : f32
    %111 = vector.broadcast %cst_48 : f32 to vector<20x1xf32>
    %112 = arith.divf %110, %111 : vector<20x1xf32>
    %113 = vector.broadcast %105 : vector<20x1xf32> to vector<20x32xf32>
    %114 = arith.subf %101, %113 : vector<20x32xf32>
    %cst_49 = arith.constant 9.99999974E-6 : f32
    %115 = vector.broadcast %cst_49 : f32 to vector<20x1xf32>
    %116 = arith.addf %112, %115 : vector<20x1xf32>
    %117 = math.rsqrt %116 : vector<20x1xf32>
    %118 = vector.broadcast %117 : vector<20x1xf32> to vector<20x32xf32>
    %119 = arith.mulf %114, %118 : vector<20x32xf32>
    %120 = vector.broadcast %8 : vector<1x32xf32> to vector<20x32xf32>
    %121 = arith.mulf %119, %120 : vector<20x32xf32>
    %122 = vector.broadcast %9 : vector<1x32xf32> to vector<20x32xf32>
    %123 = arith.addf %121, %122 : vector<20x32xf32>
    %c1 = arith.constant 1 : index
    %c0_50 = arith.constant 0 : index
    %c0_51 = arith.constant 0 : index
    %124 = vector.load %arg5[%c1, %c0_50, %c0_51] : memref<2x6x32xf32, #tpu.memory_space<vmem>>, vector<1x6x32xf32>
    %125 = vector.shape_cast %124 : vector<1x6x32xf32> to vector<6x32xf32>
    %126 = vector.extract_strided_slice %125 {offsets = [0, 0], sizes = [1, 32], strides = [1, 1]} : vector<6x32xf32> to vector<1x32xf32>
    %127 = vector.extract_strided_slice %125 {offsets = [1, 0], sizes = [1, 32], strides = [1, 1]} : vector<6x32xf32> to vector<1x32xf32>
    %128 = vector.extract_strided_slice %125 {offsets = [2, 0], sizes = [1, 32], strides = [1, 1]} : vector<6x32xf32> to vector<1x32xf32>
    %129 = vector.extract_strided_slice %125 {offsets = [3, 0], sizes = [1, 32], strides = [1, 1]} : vector<6x32xf32> to vector<1x32xf32>
    %130 = vector.extract_strided_slice %125 {offsets = [4, 0], sizes = [1, 32], strides = [1, 1]} : vector<6x32xf32> to vector<1x32xf32>
    %131 = vector.extract_strided_slice %125 {offsets = [5, 0], sizes = [1, 32], strides = [1, 1]} : vector<6x32xf32> to vector<1x32xf32>
    %c1_52 = arith.constant 1 : index
    %c0_53 = arith.constant 0 : index
    %c0_54 = arith.constant 0 : index
    %132 = vector.load %arg2[%c1_52, %c0_53, %c0_54] : memref<2x32x96xf32, #tpu.memory_space<vmem>>, vector<1x32x96xf32>
    %133 = vector.shape_cast %132 : vector<1x32x96xf32> to vector<32x96xf32>
    %cst_55 = arith.constant dense<0.000000e+00> : vector<20x96xf32>
    %134 = tpu.matmul %123, %133, %cst_55 {dimension_numbers = #tpu.dot_dimension_numbers<[1], [0], [0], [1], [0, 0, 1, 1], [], []>} : vector<20x32xf32>, vector<32x96xf32>, vector<20x96xf32> -> vector<20x96xf32>
    %c1_56 = arith.constant 1 : index
    %c0_57 = arith.constant 0 : index
    %c0_58 = arith.constant 0 : index
    %135 = vector.load %arg3[%c1_56, %c0_57, %c0_58] : memref<2x1x96xf32, #tpu.memory_space<vmem>>, vector<1x1x96xf32>
    %136 = vector.shape_cast %135 : vector<1x1x96xf32> to vector<1x96xf32>
    %137 = vector.broadcast %136 : vector<1x96xf32> to vector<20x96xf32>
    %138 = arith.addf %134, %137 : vector<20x96xf32>
    %cst_59 = arith.constant 0.000000e+00 : f32
    %139 = vector.broadcast %cst_59 : f32 to vector<20x20xf32>
    %140 = vector.extract_strided_slice %138 {offsets = [0, 0], sizes = [20, 16], strides = [1, 1]} : vector<20x96xf32> to vector<20x16xf32>
    %cst_60 = arith.constant 2.500000e-01 : f32
    %141 = vector.broadcast %cst_60 : f32 to vector<20x16xf32>
    %142 = arith.mulf %140, %141 : vector<20x16xf32>
    %143 = vector.extract_strided_slice %138 {offsets = [0, 32], sizes = [20, 16], strides = [1, 1]} : vector<20x96xf32> to vector<20x16xf32>
    %144 = vector.extract_strided_slice %138 {offsets = [0, 64], sizes = [20, 16], strides = [1, 1]} : vector<20x96xf32> to vector<20x16xf32>
    %cst_61 = arith.constant dense<0.000000e+00> : vector<20x20xf32>
    %145 = tpu.matmul %142, %143, %cst_61 {dimension_numbers = #tpu.dot_dimension_numbers<[1], [1], [0], [0], [0, 0, 1, 0], [], []>} : vector<20x16xf32>, vector<20x16xf32>, vector<20x20xf32> -> vector<20x20xf32>
    %146 = arith.addf %145, %1 : vector<20x20xf32>
    %cst_62 = arith.constant dense<0xFF800000> : vector<20xf32>
    %147 = vector.multi_reduction <maximumf>, %146, %cst_62 [1] : vector<20x20xf32> to vector<20xf32>
    %148 = vector.shape_cast %147 : vector<20xf32> to vector<20x1xf32>
    %149 = vector.broadcast %148 : vector<20x1xf32> to vector<20x20xf32>
    %150 = arith.subf %146, %149 : vector<20x20xf32>
    %151 = math.exp %150 : vector<20x20xf32>
    %cst_63 = arith.constant dense<0.000000e+00> : vector<20xf32>
    %152 = vector.multi_reduction <add>, %151, %cst_63 [1] : vector<20x20xf32> to vector<20xf32>
    %153 = vector.shape_cast %152 : vector<20xf32> to vector<20x1xf32>
    %154 = tpu.reciprocal %153 {approx = true} : vector<20x1xf32> -> vector<20x1xf32>
    %155 = vector.broadcast %154 : vector<20x1xf32> to vector<20x20xf32>
    %156 = arith.mulf %151, %155 : vector<20x20xf32>
    %157 = arith.addf %139, %156 : vector<20x20xf32>
    %cst_64 = arith.constant dense<0.000000e+00> : vector<20x16xf32>
    %158 = tpu.matmul %156, %144, %cst_64 {dimension_numbers = #tpu.dot_dimension_numbers<[1], [0], [0], [1], [0, 0, 1, 1], [], []>} : vector<20x20xf32>, vector<20x16xf32>, vector<20x16xf32> -> vector<20x16xf32>
    %159 = vector.extract_strided_slice %138 {offsets = [0, 16], sizes = [20, 16], strides = [1, 1]} : vector<20x96xf32> to vector<20x16xf32>
    %cst_65 = arith.constant 2.500000e-01 : f32
    %160 = vector.broadcast %cst_65 : f32 to vector<20x16xf32>
    %161 = arith.mulf %159, %160 : vector<20x16xf32>
    %162 = vector.extract_strided_slice %138 {offsets = [0, 48], sizes = [20, 16], strides = [1, 1]} : vector<20x96xf32> to vector<20x16xf32>
    %163 = vector.extract_strided_slice %138 {offsets = [0, 80], sizes = [20, 16], strides = [1, 1]} : vector<20x96xf32> to vector<20x16xf32>
    %cst_66 = arith.constant dense<0.000000e+00> : vector<20x20xf32>
    %164 = tpu.matmul %161, %162, %cst_66 {dimension_numbers = #tpu.dot_dimension_numbers<[1], [1], [0], [0], [0, 0, 1, 0], [], []>} : vector<20x16xf32>, vector<20x16xf32>, vector<20x20xf32> -> vector<20x20xf32>
    %165 = arith.addf %164, %1 : vector<20x20xf32>
    %cst_67 = arith.constant dense<0xFF800000> : vector<20xf32>
    %166 = vector.multi_reduction <maximumf>, %165, %cst_67 [1] : vector<20x20xf32> to vector<20xf32>
    %167 = vector.shape_cast %166 : vector<20xf32> to vector<20x1xf32>
    %168 = vector.broadcast %167 : vector<20x1xf32> to vector<20x20xf32>
    %169 = arith.subf %165, %168 : vector<20x20xf32>
    %170 = math.exp %169 : vector<20x20xf32>
    %cst_68 = arith.constant dense<0.000000e+00> : vector<20xf32>
    %171 = vector.multi_reduction <add>, %170, %cst_68 [1] : vector<20x20xf32> to vector<20xf32>
    %172 = vector.shape_cast %171 : vector<20xf32> to vector<20x1xf32>
    %173 = tpu.reciprocal %172 {approx = true} : vector<20x1xf32> -> vector<20x1xf32>
    %174 = vector.broadcast %173 : vector<20x1xf32> to vector<20x20xf32>
    %175 = arith.mulf %170, %174 : vector<20x20xf32>
    %176 = arith.addf %157, %175 : vector<20x20xf32>
    %cst_69 = arith.constant dense<0.000000e+00> : vector<20x16xf32>
    %177 = tpu.matmul %175, %163, %cst_69 {dimension_numbers = #tpu.dot_dimension_numbers<[1], [0], [0], [1], [0, 0, 1, 1], [], []>} : vector<20x20xf32>, vector<20x16xf32>, vector<20x16xf32> -> vector<20x16xf32>
    %cst_70 = arith.constant 5.000000e-01 : f32
    %178 = vector.broadcast %cst_70 : f32 to vector<20x20xf32>
    %179 = arith.mulf %176, %178 : vector<20x20xf32>
    %180 = tpu.concatenate %158, %177 in 1 : vector<20x16xf32>, vector<20x16xf32> -> vector<20x32xf32>
    %c1_71 = arith.constant 1 : index
    %c0_72 = arith.constant 0 : index
    %c0_73 = arith.constant 0 : index
    %181 = vector.load %arg4[%c1_71, %c0_72, %c0_73] : memref<2x32x32xf32, #tpu.memory_space<vmem>>, vector<1x32x32xf32>
    %182 = vector.shape_cast %181 : vector<1x32x32xf32> to vector<32x32xf32>
    %cst_74 = arith.constant dense<0.000000e+00> : vector<20x32xf32>
    %183 = tpu.matmul %180, %182, %cst_74 {dimension_numbers = #tpu.dot_dimension_numbers<[1], [0], [0], [1], [0, 0, 1, 1], [], []>} : vector<20x32xf32>, vector<32x32xf32>, vector<20x32xf32> -> vector<20x32xf32>
    %184 = vector.broadcast %126 : vector<1x32xf32> to vector<20x32xf32>
    %185 = arith.addf %183, %184 : vector<20x32xf32>
    %186 = arith.addf %123, %185 : vector<20x32xf32>
    %cst_75 = arith.constant dense<0.000000e+00> : vector<20xf32>
    %187 = vector.multi_reduction <add>, %186, %cst_75 [1] : vector<20x32xf32> to vector<20xf32>
    %188 = vector.shape_cast %187 : vector<20xf32> to vector<20x1xf32>
    %cst_76 = arith.constant 3.200000e+01 : f32
    %189 = vector.broadcast %cst_76 : f32 to vector<20x1xf32>
    %190 = arith.divf %188, %189 : vector<20x1xf32>
    %191 = vector.broadcast %190 : vector<20x1xf32> to vector<20x32xf32>
    %192 = arith.subf %186, %191 : vector<20x32xf32>
    %193 = arith.mulf %192, %192 : vector<20x32xf32>
    %cst_77 = arith.constant dense<0.000000e+00> : vector<20xf32>
    %194 = vector.multi_reduction <add>, %193, %cst_77 [1] : vector<20x32xf32> to vector<20xf32>
    %195 = vector.shape_cast %194 : vector<20xf32> to vector<20x1xf32>
    %cst_78 = arith.constant 3.200000e+01 : f32
    %196 = vector.broadcast %cst_78 : f32 to vector<20x1xf32>
    %197 = arith.divf %195, %196 : vector<20x1xf32>
    %198 = vector.broadcast %190 : vector<20x1xf32> to vector<20x32xf32>
    %199 = arith.subf %186, %198 : vector<20x32xf32>
    %cst_79 = arith.constant 9.99999974E-6 : f32
    %200 = vector.broadcast %cst_79 : f32 to vector<20x1xf32>
    %201 = arith.addf %197, %200 : vector<20x1xf32>
    %202 = math.rsqrt %201 : vector<20x1xf32>
    %203 = vector.broadcast %202 : vector<20x1xf32> to vector<20x32xf32>
    %204 = arith.mulf %199, %203 : vector<20x32xf32>
    %205 = vector.broadcast %127 : vector<1x32xf32> to vector<20x32xf32>
    %206 = arith.mulf %204, %205 : vector<20x32xf32>
    %207 = vector.broadcast %128 : vector<1x32xf32> to vector<20x32xf32>
    %208 = arith.addf %206, %207 : vector<20x32xf32>
    %c1_80 = arith.constant 1 : index
    %c0_81 = arith.constant 0 : index
    %c0_82 = arith.constant 0 : index
    %209 = vector.load %arg6[%c1_80, %c0_81, %c0_82] : memref<2x32x64xf32, #tpu.memory_space<vmem>>, vector<1x32x64xf32>
    %210 = vector.shape_cast %209 : vector<1x32x64xf32> to vector<32x64xf32>
    %cst_83 = arith.constant dense<0.000000e+00> : vector<20x64xf32>
    %211 = tpu.matmul %208, %210, %cst_83 {dimension_numbers = #tpu.dot_dimension_numbers<[1], [0], [0], [1], [0, 0, 1, 1], [], []>} : vector<20x32xf32>, vector<32x64xf32>, vector<20x64xf32> -> vector<20x64xf32>
    %c1_84 = arith.constant 1 : index
    %c0_85 = arith.constant 0 : index
    %c0_86 = arith.constant 0 : index
    %212 = vector.load %arg7[%c1_84, %c0_85, %c0_86] : memref<2x1x64xf32, #tpu.memory_space<vmem>>, vector<1x1x64xf32>
    %213 = vector.shape_cast %212 : vector<1x1x64xf32> to vector<1x64xf32>
    %214 = vector.broadcast %213 : vector<1x64xf32> to vector<20x64xf32>
    %215 = arith.addf %211, %214 : vector<20x64xf32>
    %cst_87 = arith.constant 0.000000e+00 : f32
    %216 = vector.broadcast %cst_87 : f32 to vector<20x64xf32>
    %217 = arith.maximumf %215, %216 : vector<20x64xf32>
    %c1_88 = arith.constant 1 : index
    %c0_89 = arith.constant 0 : index
    %c0_90 = arith.constant 0 : index
    %218 = vector.load %arg8[%c1_88, %c0_89, %c0_90] : memref<2x64x32xf32, #tpu.memory_space<vmem>>, vector<1x64x32xf32>
    %219 = vector.shape_cast %218 : vector<1x64x32xf32> to vector<64x32xf32>
    %cst_91 = arith.constant dense<0.000000e+00> : vector<20x32xf32>
    %220 = tpu.matmul %217, %219, %cst_91 {dimension_numbers = #tpu.dot_dimension_numbers<[1], [0], [0], [1], [0, 0, 1, 1], [], []>} : vector<20x64xf32>, vector<64x32xf32>, vector<20x32xf32> -> vector<20x32xf32>
    %221 = vector.broadcast %129 : vector<1x32xf32> to vector<20x32xf32>
    %222 = arith.addf %220, %221 : vector<20x32xf32>
    %223 = arith.addf %208, %222 : vector<20x32xf32>
    %cst_92 = arith.constant dense<0.000000e+00> : vector<20xf32>
    %224 = vector.multi_reduction <add>, %223, %cst_92 [1] : vector<20x32xf32> to vector<20xf32>
    %225 = vector.shape_cast %224 : vector<20xf32> to vector<20x1xf32>
    %cst_93 = arith.constant 3.200000e+01 : f32
    %226 = vector.broadcast %cst_93 : f32 to vector<20x1xf32>
    %227 = arith.divf %225, %226 : vector<20x1xf32>
    %228 = vector.broadcast %227 : vector<20x1xf32> to vector<20x32xf32>
    %229 = arith.subf %223, %228 : vector<20x32xf32>
    %230 = arith.mulf %229, %229 : vector<20x32xf32>
    %cst_94 = arith.constant dense<0.000000e+00> : vector<20xf32>
    %231 = vector.multi_reduction <add>, %230, %cst_94 [1] : vector<20x32xf32> to vector<20xf32>
    %232 = vector.shape_cast %231 : vector<20xf32> to vector<20x1xf32>
    %cst_95 = arith.constant 3.200000e+01 : f32
    %233 = vector.broadcast %cst_95 : f32 to vector<20x1xf32>
    %234 = arith.divf %232, %233 : vector<20x1xf32>
    %235 = vector.broadcast %227 : vector<20x1xf32> to vector<20x32xf32>
    %236 = arith.subf %223, %235 : vector<20x32xf32>
    %cst_96 = arith.constant 9.99999974E-6 : f32
    %237 = vector.broadcast %cst_96 : f32 to vector<20x1xf32>
    %238 = arith.addf %234, %237 : vector<20x1xf32>
    %239 = math.rsqrt %238 : vector<20x1xf32>
    %240 = vector.broadcast %239 : vector<20x1xf32> to vector<20x32xf32>
    %241 = arith.mulf %236, %240 : vector<20x32xf32>
    %242 = vector.broadcast %130 : vector<1x32xf32> to vector<20x32xf32>
    %243 = arith.mulf %241, %242 : vector<20x32xf32>
    %244 = vector.broadcast %131 : vector<1x32xf32> to vector<20x32xf32>
    %245 = arith.addf %243, %244 : vector<20x32xf32>
    %c0_97 = arith.constant 0 : index
    %c0_98 = arith.constant 0 : index
    %246 = vector.load %arg9[%c0_97, %c0_98] : memref<32x96xf32, #tpu.memory_space<vmem>>, vector<32x96xf32>
    %cst_99 = arith.constant dense<0.000000e+00> : vector<20x96xf32>
    %247 = tpu.matmul %245, %246, %cst_99 {dimension_numbers = #tpu.dot_dimension_numbers<[1], [0], [0], [1], [0, 0, 1, 1], [], []>} : vector<20x32xf32>, vector<32x96xf32>, vector<20x96xf32> -> vector<20x96xf32>
    %c0_100 = arith.constant 0 : index
    %c0_101 = arith.constant 0 : index
    %248 = vector.load %arg10[%c0_100, %c0_101] : memref<1x96xf32, #tpu.memory_space<vmem>>, vector<1x96xf32>
    %249 = vector.broadcast %248 : vector<1x96xf32> to vector<20x96xf32>
    %250 = arith.addf %247, %249 : vector<20x96xf32>
    %251 = vector.extract_strided_slice %250 {offsets = [0, 0], sizes = [20, 64], strides = [1, 1]} : vector<20x96xf32> to vector<20x64xf32>
    %cst_102 = arith.constant dense<0xFF800000> : vector<20xf32>
    %252 = vector.multi_reduction <maximumf>, %251, %cst_102 [1] : vector<20x64xf32> to vector<20xf32>
    %253 = vector.shape_cast %252 : vector<20xf32> to vector<20x1xf32>
    %254 = vector.broadcast %253 : vector<20x1xf32> to vector<20x64xf32>
    %255 = arith.subf %251, %254 : vector<20x64xf32>
    %256 = math.exp %255 : vector<20x64xf32>
    %cst_103 = arith.constant dense<0.000000e+00> : vector<20xf32>
    %257 = vector.multi_reduction <add>, %256, %cst_103 [1] : vector<20x64xf32> to vector<20xf32>
    %258 = vector.shape_cast %257 : vector<20xf32> to vector<20x1xf32>
    %259 = math.log %258 : vector<20x1xf32>
    %260 = arith.addf %253, %259 : vector<20x1xf32>
    %261 = vector.broadcast %260 : vector<20x1xf32> to vector<20x64xf32>
    %262 = arith.subf %251, %261 : vector<20x64xf32>
    %263 = vector.extract_strided_slice %250 {offsets = [0, 64], sizes = [20, 32], strides = [1, 1]} : vector<20x96xf32> to vector<20x32xf32>
    %264 = arith.negf %263 : vector<20x32xf32>
    %265 = math.exp %264 : vector<20x32xf32>
    %cst_104 = arith.constant 1.000000e+00 : f32
    %266 = vector.broadcast %cst_104 : f32 to vector<20x32xf32>
    %267 = arith.addf %266, %265 : vector<20x32xf32>
    %268 = arith.divf %266, %267 : vector<20x32xf32>
    %c0_105 = arith.constant 0 : index
    %c0_106 = arith.constant 0 : index
    %269 = vector.load %arg11[%c0_105, %c0_106] : memref<32x1xf32, #tpu.memory_space<vmem>>, vector<32x1xf32>
    %cst_107 = arith.constant dense<0.000000e+00> : vector<20x1xf32>
    %270 = tpu.matmul %268, %269, %cst_107 {dimension_numbers = #tpu.dot_dimension_numbers<[1], [0], [0], [1], [0, 0, 1, 1], [], []>} : vector<20x32xf32>, vector<32x1xf32>, vector<20x1xf32> -> vector<20x1xf32>
    %c0_108 = arith.constant 0 : index
    %c0_109 = arith.constant 0 : index
    %271 = vector.load %arg12[%c0_108, %c0_109] : memref<1x1xf32, #tpu.memory_space<vmem>>, vector<1x1xf32>
    %272 = vector.broadcast %271 : vector<1x1xf32> to vector<20x1xf32>
    %273 = arith.addf %270, %272 : vector<20x1xf32>
    %cst_110 = arith.constant 0.000000e+00 : f32
    %274 = vector.broadcast %cst_110 : f32 to vector<20x23xf32>
    %275 = tpu.concatenate %262, %273, %57, %179, %274 in 1 : vector<20x64xf32>, vector<20x1xf32>, vector<20x20xf32>, vector<20x20xf32>, vector<20x23xf32> -> vector<20x128xf32>
    %c0_111 = arith.constant 0 : index
    %c0_112 = arith.constant 0 : index
    %276 = vector.load %arg13[%c0_111, %c0_112] : memref<20x128xf32, #tpu.memory_space<vmem>>, vector<20x128xf32>
    tpu.vector_store %arg13[%c0_111, %c0_112], %275 {strides = array<i32>} : memref<20x128xf32, #tpu.memory_space<vmem>>, vector<20x128xf32>,
    return
  }
}

</mosaic_0001>

<bundles_post_ra>
// kernel: squeeze.8
= control target key start
LH: loop header
LB: loop body
LE: loop exit
PB: predicated region body
PF: predicated region fallthrough
CT: control target
= control target key end

     0   :  { %vm8_vm0 = vcmask 80896   ;;  %s42_s0 = inlined_call_operand.vmem [shape: f32[20], index: 0, kind: input, shape index: {}]   ;;  %s43_s1 = inlined_call_operand.vmem [shape: f32[2,10], index: 1, kind: output, shape index: {}]  }
   0x1   :  { %v5_v0 = vld [vmem:[%s42_s0] sm:$0x1]  ;;  %s25_s0 = smov 118  }
   0x2   :  { %6 = vst [vmem:[#allocation1] sm:$0x1] %v5_v0 }
   0x9   :  { %v10_v1 = vld [vmem:[#allocation1] sm:$0x1]  }
   0xa   :  { %v7_v2 = vld [vmem:[#allocation1] sm:$0x1]   ;;  %11 = vrot.lane.b32.xlu0 %v10_v1, %s25_s0 }
   0xb   :  { %9 = vst.msk [vmem:[#allocation0] sm:$0x1] %vm8_vm0, %v7_v2  }
  0x7c   :  { %v12_v3 = vpop.permute.xlu0 %11  }
  0x7d   :  { %15 = vst.msk [vmem:[#allocation0 + $0x1] sm:$0x1] %vm8_vm0, %v12_v3  }
  0x84   :  { %v20_v4 = vld [vmem:[#allocation0] sm:$0x3] }
  0x85   :  { %23 = vst [vmem:[%s43_s1] sm:$0x3] %v20_v4 }

// kernel: peter_forward.1
= control target key start
LH: loop header
LB: loop body
LE: loop exit
PB: predicated region body
PF: predicated region fallthrough
CT: control target
= control target key end

     0   :  { %v3061_v0 = vmov 0.0   ;;  %vm3062_vm0 = vmmov 0   ;;  %vm64_vm1 = vcmask 261120   ;;  %s3063_s24 = smov 96   ;;  %vm166_vm2 = vcmask 130048   ;;  %s3064_s30 = smov 64   ;;  %s3909_s2 = inlined_call_operand.vmem [shape: f32[2,32,96], index: 2, kind: input, shape index: {}]   ;;  %s3910_s0 = inlined_call_operand.vmem [shape: f32[20,32], index: 0, kind: input, shape index: {}]   ;;  %s3911_s3 = inlined_call_operand.vmem [shape: f32[2,1,96], index: 3, kind: input, shape index: {}]   ;;  %s3912_s1 = inlined_call_operand.vmem [shape: f32[20,20], index: 1, kind: input, shape index: {}]   ;;  %s3913_s4 = inlined_call_operand.vmem [shape: f32[2,32,32], index: 4, kind: input, shape index: {}]   ;;  %s3914_s5 = inlined_call_operand.vmem [shape: f32[2,6,32], index: 5, kind: input, shape index: {}]   ;;  %s3915_s6 = inlined_call_operand.vmem [shape: f32[2,32,64], index: 6, kind: input, shape index: {}]   ;;  %s3916_s8 = inlined_call_operand.vmem [shape: f32[2,64,32], index: 8, kind: input, shape index: {}]   ;;  %s3917_s7 = inlined_call_operand.vmem [shape: f32[2,1,64], index: 7, kind: input, shape index: {}]   ;;  %s3918_s9 = inlined_call_operand.vmem [shape: f32[32,96], index: 9, kind: input, shape index: {}]   ;;  %s3919_s11 = inlined_call_operand.vmem [shape: f32[32,1], index: 11, kind: input, shape index: {}]   ;;  %s3920_s10 = inlined_call_operand.vmem [shape: f32[1,96], index: 10, kind: input, shape index: {}]   ;;  %s3921_s12 = inlined_call_operand.<no memory space> [shape: f32[1,1], index: 12, kind: input, shape index: {}]   ;;  %s3922_s13 = inlined_call_operand.vmem [shape: f32[20,128], index: 13, kind: output, shape index: {}]  }
   0x1   :  { %2643 = vmatprep.subr.mxu1 %v3061_v0  ;;  %v56_v1 = vld [vmem:[%s3909_s2 + $0x18] sm:$0xff]  ;;  %v55_v2 = vld [vmem:[%s3909_s2 + $0x10] sm:$0xff]  ;;  %2651 = vmatprep.mubr.msk.f32.mxu1 %vm3062_vm0, %v3061_v0  ;;  %v54_v3 = vld [vmem:[%s3909_s2 + $0x8] sm:$0xff]  ;;  %vm262_vm3 = vcmask 162816   ;;  %vm269_vm4 = vcmask 158720   ;;  %vm317_vm5 = vcmask 1043456  }
   0x2   :  { %2644 = vmatpush3.msra.mxu1 %v56_v1  ;;  %2675 = vmatprep.subr.mxu0 %v3061_v0  ;;  %v53_v4 = vld [vmem:[%s3909_s2] sm:$0xff]  ;;  %v3175_v6 = vld [vmem:[%s3910_s0 + $0x8] sm:$0xff]  ;;  %v3184_v7 = vld [vmem:[%s3910_s0 + $0x10] sm:$0xf]  ;;  %s3066_s14 = smov 112   ;;  %s3067_s15 = smov 48  }
   0x3   :  { %2645 = vmatprep.subr.mxu1 %v3061_v0  ;;  %2681 = vmatprep.mubr.msk.f32.mxu0 %vm3062_vm0, %v3061_v0  ;;  %v3164_v5 = vld [vmem:[%s3910_s0] sm:$0xff]  ;;  %v3238_v28 = vld [vmem:[%s3912_s1 + $0x8] sm:$0xff]  ;;  %v3245_v33 = vld [vmem:[%s3912_s1 + $0x10] sm:$0xf]  ;;  %s3068_s0 = smov 16   ;;  %vm763_vm6 = vcmask 257024  }
   0x4   :  { %2646 = vmatpush3.msra.mxu1 %v55_v2  ;;  %v2415_v8 = vld [vmem:[%s3911_s3] ss:$0 sm:$0xff]  ;;  %vm927_vm7 = vcmask 523264   ;;  %vm2199_vm8 = vcmask 519168   ;;  %vm2396_vm9 = vcmask 531456   ;;  %vm2400_vm10 = vcmask 695296  }
   0x5   :  { %2647 = vmatprep.subr.mxu1 %v3061_v0  ;;  %v3232_v24 = vld [vmem:[%s3912_s1] sm:$0xff]  ;;  %s3065_s1 = smov 80   ;;  %vm2404_vm11 = vcmask 859136  }
   0x6   :  { %2648 = vmatpush3.msra.mxu1 %v54_v3 }
   0x7   :  { %2649 = vmatprep.subr.mxu1 %v3061_v0 }
   0x8   :  { %2650 = vmatpush3.msra.mxu1 %v53_v4 }
   0x9   :  { %2652 = vmatmul.mubr.msk.f32.vlgmr.msra.gmra.mxu1 %vm64_vm1, %v3164_v5  ;;  %2660 = vmatprep.subr.mxu1 %v3061_v0 }
   0xa   :  { %2654 = vmatprep.mubr.msk.f32.mxu1 %vm3062_vm0, %v3061_v0 }
   0xd   :  { %2655 = vmatmul.mubr.msk.f32.gmra.mxu1 %vm64_vm1, %v3175_v6 }
   0xe   :  { %2657 = vmatprep.mubr.msk.f32.mxu1 %vm3062_vm0, %v3061_v0 }
  0x11   :  { %2658 = vmatmul.mubr.msk.f32.gmra.mxu1 %vm64_vm1, %v3184_v7 }
  0x12   :  { %2666 = vmatprep.mubr.msk.f32.mxu1 %vm3062_vm0, %v3061_v0 }
  0xc9   :  { %v140_v9 = vpop.f32.mrf.mxu1 }
  0xca   :  { %v3193_v10 = vadd.f32 %v2415_v8, %v140_v9 }
  0xcb   :  { %v2653_v11 = vpop.f32.mrf.mxu1 }
  0xcc   :  { %160 = vrot.lane.b32.xlu1 %v3193_v10, %s3063_s24  ;;  %v3211_v21 = vmul.f32 0.25, %v3193_v10 }
  0xcd   :  { %v145_v12 = vpop.f32.mrf.mxu1 }
  0xce   :  { %v3201_v17 = vadd.f32 %v2415_v8, %v145_v12 }
  0xcf   :  { %v2656_v13 = vpop.f32.mrf.mxu1 }
  0xd0   :  { %v155_v22 = vmul.f32 0.25, %v3201_v17 }
  0xd1   :  { %v150_v14 = vpop.f32.mrf.mxu1 }
  0xd2   :  { %v3197_v15 = vadd.f32 %v2415_v8, %v150_v14 }
  0xd3   :  { %v2659_v16 = vpop.f32.mrf.mxu1 }
  0xd4   :  { %164 = vrot.lane.b32.xlu0 %v3197_v15, %s3063_s24  ;;  %v3223_v23 = vmul.f32 0.25, %v3197_v15 }
  0xd8   :  { %162 = vrot.lane.b32.xlu0 %v3201_v17, %s3063_s24 }
 0x13e   :  { %v161_v20 = vpop.permute.xlu1 %160 }
 0x146   :  { %v165_v18 = vpop.permute.xlu0 %164 }
 0x147   :  { %2661 = vmatpush3.xpose.msk.msra.mxu1 %vm166_vm2, %v165_v18 }
 0x148   :  { %2662 = vmatprep.subr.mxu1 %v3061_v0 }
 0x14a   :  { %v163_v19 = vpop.permute.xlu0 %162 }
 0x14b   :  { %2663 = vmatpush3.xpose.msk.msra.mxu1 %vm166_vm2, %v163_v19 }
 0x14c   :  { %2664 = vmatprep.subr.mxu1 %v3061_v0 }
 0x14f   :  { %2665 = vmatpush3.xpose.msk.msra.mxu1 %vm166_vm2, %v161_v20 }
 0x150   :  { %2949 = vmatprep.subr.mxu1 %v3061_v0 }
 0x152   :  { %2667 = vmatmul.mubr.msk.f32.vlgmr.msra.gmra.mxu1 %vm166_vm2, %v3211_v21 }
 0x153   :  { %2669 = vmatprep.mubr.msk.f32.mxu1 %vm3062_vm0, %v3061_v0 }
 0x156   :  { %2670 = vmatmul.mubr.msk.f32.gmra.mxu1 %vm166_vm2, %v155_v22 }
 0x157   :  { %2672 = vmatprep.mubr.msk.f32.mxu1 %vm3062_vm0, %v3061_v0 }
 0x15a   :  { %2673 = vmatmul.mubr.msk.f32.gmra.mxu1 %vm166_vm2, %v3223_v23 }
 0x15b   :  { %2699 = vmatprep.mubr.msk.f32.mxu1 %vm3062_vm0, %v3061_v0 }
 0x212   :  { %v248_v25 = vpop.f32.mrf.mxu1 }
 0x213   :  { %v249_v26 = vadd.f32 %v248_v25, %v3232_v24 }
 0x214   :  { %v2668_v27 = vpop.f32.mrf.mxu1 }
 0x215   :  { %v263_v29 = vsel %vm262_vm3, %v249_v26, -inf }
 0x216   :  { %264 = vmax.xlane.f32.xlu1 %v263_v29  ;;  %v253_v30 = vpop.f32.mrf.mxu1 }
 0x217   :  { %v254_v31 = vadd.f32 %v253_v30, %v3238_v28 }
 0x218   :  { %v2671_v32 = vpop.f32.mrf.mxu1 }
 0x219   :  { %v266_v34 = vsel %vm262_vm3, %v254_v31, -inf }
 0x21a   :  { %267 = vmax.xlane.f32.xlu0 %v266_v34  ;;  %v258_v35 = vpop.f32.mrf.mxu1 }
 0x21b   :  { %v259_v36 = vadd.f32 %v258_v35, %v3245_v33 }
 0x21c   :  { %v2674_v37 = vpop.f32.mrf.mxu1 }
 0x21d   :  { %v270_v38 = vsel %vm269_vm4, %v259_v36, -inf }
 0x21e   :  { %271 = vmax.xlane.f32.xlu0 %v270_v38 }
 0x227   :  { %302 = vrot.lane.b32.xlu1 %v3201_v17, %s3064_s30 }
 0x22b   :  { %300 = vrot.lane.b32.xlu1 %v3193_v10, %s3064_s30 }
 0x234   :  { %304 = vrot.lane.b32.xlu0 %v3197_v15, %s3064_s30 }
 0x29f   :  { %v265_v39 = vpop.xlane.xlu1 %264 }
 0x2a0   :  { %v273_v40 = vsub.f32 %v249_v26, %v265_v39 }
 0x2a2   :  { %v276_v41 = vmul.f32 1.442695, %v273_v40 }
 0x2a3   :  { %v268_v42 = vpop.xlane.xlu0 %267  ;;  %v303_v46 = vpop.permute.xlu1 %302 }
 0x2a4   :  { %2965 = vpow2.f32 %v276_v41  ;;  %v274_v43 = vsub.f32 %v254_v31, %v268_v42 }
 0x2a6   :  { %v278_v44 = vmul.f32 1.442695, %v274_v43 }
 0x2a7   :  { %v272_v45 = vpop.xlane.xlu0 %271  ;;  %v301_v48 = vpop.permute.xlu1 %300 }
 0x2a8   :  { %2967 = vpow2.f32 %v278_v44  ;;  %v275_v53 = vsub.f32 %v259_v36, %v272_v45 }
 0x2aa   :  { %v280_v54 = vmul.f32 1.442695, %v275_v53 }
 0x2ab   :  { %v305_v47 = vpop.permute.xlu0 %304 }
 0x2ac   :  { %2676 = vmatpush3.msk.msra.mxu0 %vm317_vm5, %v305_v47  ;;  %2969 = vpow2.f32 %v280_v54 }
 0x2ad   :  { %2677 = vmatprep.subr.mxu0 %v3061_v0 }
 0x2ae   :  { %2678 = vmatpush3.msra.mxu0 %v303_v46 }
 0x2af   :  { %2679 = vmatprep.subr.mxu0 %v3061_v0 }
 0x2b0   :  { %2680 = vmatpush3.msra.mxu0 %v301_v48 }
 0x2b1   :  { %v2966_v49 = vpop.eup %2965  ;;  %2690 = vmatprep.subr.mxu0 %v3061_v0 }
 0x2b2   :  { %v282_v50 = vsel %vm262_vm3, %v2966_v49, 0.0 }
 0x2b3   :  { %283 = vadd.xlane.f32.xlu1 %v282_v50 }
 0x2b5   :  { %v2968_v51 = vpop.eup %2967 }
 0x2b6   :  { %v285_v52 = vsel %vm262_vm3, %v2968_v51, 0.0 }
 0x2b7   :  { %286 = vadd.xlane.f32.xlu0 %v285_v52 }
 0x2b9   :  { %v2970_v55 = vpop.eup %2969 }
 0x2ba   :  { %v288_v56 = vsel %vm269_vm4, %v2970_v55, 0.0 }
 0x2c4   :  { %408 = vrot.lane.b32.xlu1 %v3201_v17, %s3065_s1 }
 0x2cd   :  { %410 = vrot.lane.b32.xlu0 %v3197_v15, %s3065_s1 }
 0x2d1   :  { %406 = vrot.lane.b32.xlu0 %v3193_v10, %s3065_s1 }
 0x2d5   :  { %402 = vrot.lane.b32.xlu0 %v155_v22, %s3066_s14 }
 0x2e8   :  { %289 = vadd.xlane.f32.xlu1 %v288_v56 }
 0x2f9   :  { %400 = vrot.lane.b32.xlu1 %v3211_v21, %s3066_s14 }
 0x2fd   :  { %404 = vrot.lane.b32.xlu1 %v3223_v23, %s3066_s14 }
 0x33c   :  { %v284_v57 = vpop.xlane.xlu1 %283 }
 0x33d   :  { %2971 = vrcp.f32 %v284_v57 }
 0x340   :  { %v287_v58 = vpop.xlane.xlu0 %286  ;;  %v409_v60 = vpop.permute.xlu1 %408 }
 0x341   :  { %2973 = vrcp.f32 %v287_v58 }
 0x344   :  { %v411_v59 = vpop.permute.xlu0 %410 }
 0x345   :  { %2952 = vmatpush3.xpose.msk.msra.mxu1 %vm166_vm2, %v411_v59 }
 0x346   :  { %2950 = vmatprep.subr.mxu1 %v3061_v0 }
 0x348   :  { %v407_v61 = vpop.permute.xlu0 %406 }
 0x349   :  { %2953 = vmatpush3.xpose.msk.msra.mxu1 %vm166_vm2, %v409_v60 }
 0x34a   :  { %v2972_v62 = vpop.eup %2971  ;;  %2951 = vmatprep.subr.mxu1 %v3061_v0 }
 0x34b   :  { %v3278_v63 = vmul.f32 %v2972_v62, %v2966_v49  ;;  %v658_v62 = vld [vmem:[%s3913_s4 + $0x8] sm:$0xff] }
 0x34c   :  { %v403_v2 = vpop.permute.xlu0 %402 }
 0x34d   :  { %2682 = vmatmul.mubr.msk.f32.vlgmr.msra.gmra.mxu0 %vm262_vm3, %v3278_v63  ;;  %2954 = vmatpush3.xpose.msk.msra.mxu1 %vm166_vm2, %v407_v61 }
 0x34e   :  { %v2974_v1 = vpop.eup %2973  ;;  %2691 = vmatpush3.xpose.msk.msra.mxu0 %vm166_vm2, %v411_v59  ;;  %2684 = vmatprep.mubr.msk.f32.mxu0 %vm3062_vm0, %v3061_v0 }
 0x34f   :  { %2692 = vmatprep.subr.mxu0 %v3061_v0  ;;  %v3287_v3 = vmul.f32 %v2974_v1, %v2968_v51  ;;  %2720 = vmatprep.subr.mxu1 %v3061_v0  ;;  %v657_v1 = vld [vmem:[%s3913_s4] sm:$0xff] }
 0x350   :  { %2700 = vmatmul.mubr.msk.f32.vlgmr.msra.gmra.mxu1 %vm166_vm2, %v403_v2 }
 0x351   :  { %2685 = vmatmul.mubr.msk.f32.gmra.mxu0 %vm262_vm3, %v3287_v3  ;;  %2702 = vmatprep.mubr.msk.f32.mxu1 %vm3062_vm0, %v3061_v0 }
 0x352   :  { %2693 = vmatpush3.xpose.msk.msra.mxu0 %vm166_vm2, %v409_v60  ;;  %2687 = vmatprep.mubr.msk.f32.mxu0 %vm3062_vm0, %v3061_v0  ;;  %v660_v60 = vld [vmem:[%s3913_s4 + $0x18] sm:$0xff] }
 0x353   :  { %2694 = vmatprep.subr.mxu0 %v3061_v0  ;;  %2721 = vmatpush3.msra.mxu1 %v660_v60  ;;  %v812_v60 = vld [vmem:[%s3915_s6] sm:$0xff] }
 0x354   :  { %2722 = vmatprep.subr.mxu1 %v3061_v0 }
 0x356   :  { %2695 = vmatpush3.xpose.msk.msra.mxu0 %vm166_vm2, %v407_v61  ;;  %v659_v61 = vld [vmem:[%s3913_s4 + $0x10] sm:$0xff] }
 0x357   :  { %2705 = vmatprep.subr.mxu0 %v3061_v0  ;;  %2723 = vmatpush3.msra.mxu1 %v659_v61  ;;  %v922_v61 = vld [vmem:[%s3916_s8 + $0x38] sm:$0xff] }
 0x358   :  { %2724 = vmatprep.subr.mxu1 %v3061_v0 }
 0x359   :  { %2725 = vmatpush3.msra.mxu1 %v658_v62  ;;  %v921_v62 = vld [vmem:[%s3916_s8 + $0x30] sm:$0xff] }
 0x35a   :  { %2726 = vmatprep.subr.mxu1 %v3061_v0 }
 0x35b   :  { %2727 = vmatpush3.msra.mxu1 %v657_v1  ;;  %v920_v1 = vld [vmem:[%s3916_s8 + $0x28] sm:$0xff] }
 0x35c   :  { %2754 = vmatprep.subr.mxu1 %v3061_v0 }
 0x371   :  { %v290_v4 = vpop.xlane.xlu1 %289 }
 0x372   :  { %2975 = vrcp.f32 %v290_v4 }
 0x375   :  { %v401_v8 = vpop.permute.xlu1 %400 }
 0x379   :  { %v405_v9 = vpop.permute.xlu1 %404 }
 0x37a   :  { %2703 = vmatmul.mubr.msk.f32.gmra.mxu1 %vm166_vm2, %v405_v9 }
 0x37b   :  { %2728 = vmatprep.mubr.msk.f32.mxu1 %vm3062_vm0, %v3061_v0 }
 0x37f   :  { %v2976_v11 = vpop.eup %2975 }
 0x380   :  { %v3304_v12 = vmul.f32 %v2976_v11, %v2970_v55 }
 0x382   :  { %2688 = vmatmul.mubr.msk.f32.gmra.mxu0 %vm262_vm3, %v3304_v12 }
 0x383   :  { %2696 = vmatprep.mubr.msk.f32.mxu0 %vm3062_vm0, %v3061_v0 }
 0x386   :  { %2697 = vmatmul.mubr.msk.f32.vlgmr.msra.gmra.mxu0 %vm166_vm2, %v401_v8 }
 0x387   :  { %2711 = vmatprep.mubr.msk.f32.mxu0 %vm3062_vm0, %v3061_v0 }
 0x40d   :  { %v3313_v13 = vpop.f32.mrf.mxu0 }
 0x40f   :  { %v2683_v14 = vpop.f32.mrf.mxu0 }
 0x410   :  { %v495_v16 = vpop.f32.mrf.mxu1 }
 0x411   :  { %v496_v18 = vadd.f32 %v495_v16, %v3238_v28  ;;  %v3316_v19 = vpop.f32.mrf.mxu0 }
 0x412   :  { %v2701_v20 = vpop.f32.mrf.mxu1 }
 0x413   :  { %v2686_v21 = vpop.f32.mrf.mxu0  ;;  %v507_v22 = vsel %vm262_vm3, %v496_v18, -inf }
 0x414   :  { %508 = vmax.xlane.f32.xlu1 %v507_v22 }
 0x43a   :  { %v500_v23 = vpop.f32.mrf.mxu1 }
 0x43b   :  { %v501_v32 = vadd.f32 %v500_v23, %v3245_v33 }
 0x43c   :  { %v2704_v25 = vpop.f32.mrf.mxu1 }
 0x43d   :  { %v510_v35 = vsel %vm269_vm4, %v501_v32, -inf }
 0x442   :  { %v3319_v26 = vpop.f32.mrf.mxu0 }
 0x444   :  { %v2689_v27 = vpop.f32.mrf.mxu0 }
 0x446   :  { %v490_v29 = vpop.f32.mrf.mxu0 }
 0x447   :  { %v491_v30 = vadd.f32 %v490_v29, %v3232_v24 }
 0x448   :  { %v2698_v31 = vpop.f32.mrf.mxu0 }
 0x449   :  { %v504_v34 = vsel %vm262_vm3, %v491_v30, -inf }
 0x44a   :  { %505 = vmax.xlane.f32.xlu0 %v504_v34 }
 0x44e   :  { %511 = vmax.xlane.f32.xlu0 %v510_v35 }
 0x49d   :  { %v509_v36 = vpop.xlane.xlu1 %508 }
 0x49e   :  { %v514_v37 = vsub.f32 %v496_v18, %v509_v36 }
 0x4a0   :  { %v518_v38 = vmul.f32 1.442695, %v514_v37 }
 0x4a2   :  { %2977 = vpow2.f32 %v518_v38 }
 0x4af   :  { %v2978_v39 = vpop.eup %2977 }
 0x4b0   :  { %v525_v40 = vsel %vm262_vm3, %v2978_v39, 0.0 }
 0x4b1   :  { %526 = vadd.xlane.f32.xlu1 %v525_v40 }
 0x4c2   :  { %544 = vrot.lane.b32.xlu1 %v3197_v15, %s3067_s15 }
 0x4c6   :  { %540 = vrot.lane.b32.xlu1 %v3193_v10, %s3067_s15 }
 0x4d3   :  { %v506_v41 = vpop.xlane.xlu0 %505 }
 0x4d4   :  { %v513_v42 = vsub.f32 %v491_v30, %v506_v41 }
 0x4d6   :  { %v516_v45 = vmul.f32 1.442695, %v513_v42 }
 0x4d7   :  { %v512_v43 = vpop.xlane.xlu0 %511 }
 0x4d8   :  { %v515_v44 = vsub.f32 %v501_v32, %v512_v43 }
 0x4da   :  { %v520_v46 = vmul.f32 1.442695, %v515_v44 }
 0x4dc   :  { %2979 = vpow2.f32 %v520_v46 }
 0x4dd   :  { %2981 = vpow2.f32 %v516_v45 }
 0x4e9   :  { %v2980_v47 = vpop.eup %2979 }
 0x4ea   :  { %v528_v48 = vsel %vm269_vm4, %v2980_v47, 0.0  ;;  %v2982_v49 = vpop.eup %2981 }
 0x4eb   :  { %529 = vadd.xlane.f32.xlu0 %v528_v48  ;;  %v522_v50 = vsel %vm262_vm3, %v2982_v49, 0.0 }
 0x4ef   :  { %523 = vadd.xlane.f32.xlu0 %v522_v50 }
 0x505   :  { %542 = vrot.lane.b32.xlu0 %v3201_v17, %s3067_s15 }
 0x53a   :  { %v527_v10 = vpop.xlane.xlu1 %526 }
 0x53e   :  { %v545_v15 = vpop.permute.xlu1 %544 }
 0x53f   :  { %2706 = vmatpush3.msk.msra.mxu0 %vm317_vm5, %v545_v15 }
 0x540   :  { %2707 = vmatprep.subr.mxu0 %v3061_v0 }
 0x542   :  { %v541_v54 = vpop.permute.xlu1 %540 }
 0x574   :  { %v530_v51 = vpop.xlane.xlu0 %529 }
 0x578   :  { %v524_v52 = vpop.xlane.xlu0 %523 }
 0x579   :  { %2983 = vrcp.f32 %v524_v52 }
 0x57a   :  { %2985 = vrcp.f32 %v527_v10 }
 0x57b   :  { %2987 = vrcp.f32 %v530_v51 }
 0x57c   :  { %v543_v53 = vpop.permute.xlu0 %542 }
 0x57d   :  { %2708 = vmatpush3.msra.mxu0 %v543_v53 }
 0x57e   :  { %2709 = vmatprep.subr.mxu0 %v3061_v0 }
 0x57f   :  { %2710 = vmatpush3.msra.mxu0 %v541_v54 }
 0x580   :  { %2737 = vmatprep.subr.mxu0 %v3061_v0 }
 0x586   :  { %v2984_v17 = vpop.eup %2983 }
 0x587   :  { %v3338_v55 = vmul.f32 %v2984_v17, %v2982_v49  ;;  %v2986_v56 = vpop.eup %2985  ;;  %v815_v17 = vld [vmem:[%s3915_s6 + $0x18] sm:$0xff] }
 0x588   :  { %v3344_v57 = vmul.f32 %v2986_v56, %v2978_v39  ;;  %v2988_v58 = vpop.eup %2987  ;;  %v814_v56 = vld [vmem:[%s3915_s6 + $0x10] sm:$0xff] }
 0x589   :  { %2712 = vmatmul.mubr.msk.f32.vlgmr.msra.gmra.mxu0 %vm262_vm3, %v3338_v55  ;;  %v3350_v59 = vmul.f32 %v2988_v58, %v2980_v47  ;;  %v813_v58 = vld [vmem:[%s3915_s6 + $0x8] sm:$0xff] }
 0x58a   :  { %2714 = vmatprep.mubr.msk.f32.mxu0 %vm3062_vm0, %v3061_v0  ;;  %2738 = vmatpush3.msra.mxu0 %v815_v17 }
 0x58b   :  { %2739 = vmatprep.subr.mxu0 %v3061_v0 }
 0x58c   :  { %2740 = vmatpush3.msra.mxu0 %v814_v56 }
 0x58d   :  { %2715 = vmatmul.mubr.msk.f32.gmra.mxu0 %vm262_vm3, %v3344_v57  ;;  %2741 = vmatprep.subr.mxu0 %v3061_v0 }
 0x58e   :  { %2717 = vmatprep.mubr.msk.f32.mxu0 %vm3062_vm0, %v3061_v0  ;;  %2742 = vmatpush3.msra.mxu0 %v813_v58 }
 0x58f   :  { %2743 = vmatprep.subr.mxu0 %v3061_v0 }
 0x590   :  { %2744 = vmatpush3.msra.mxu0 %v812_v60 }
 0x591   :  { %2718 = vmatmul.mubr.msk.f32.gmra.mxu0 %vm262_vm3, %v3350_v59  ;;  %2779 = vmatprep.subr.mxu0 %v3061_v0 }
 0x592   :  { %2745 = vmatprep.mubr.msk.f32.mxu0 %vm3062_vm0, %v3061_v0 }
 0x649   :  { %v625_v2 = vpop.f32.mrf.mxu0 }
 0x64a   :  { %645 = vrot.lane.b32.xlu1 %v625_v2, %s3068_s0  ;;  %v919_v2 = vld [vmem:[%s3916_s8 + $0x20] sm:$0xff] }
 0x64b   :  { %v2713_v4 = vpop.f32.mrf.mxu0 }
 0x64c   :  { %v918_v4 = vld [vmem:[%s3916_s8 + $0x18] sm:$0xff] }
 0x64d   :  { %v630_v8 = vpop.f32.mrf.mxu0 }
 0x64e   :  { %647 = vrot.lane.b32.xlu0 %v630_v8, %s3068_s0 }
 0x64f   :  { %v2716_v9 = vpop.f32.mrf.mxu0 }
 0x651   :  { %v635_v11 = vpop.f32.mrf.mxu0 }
 0x652   :  { %649 = vrot.lane.b32.xlu1 %v635_v11, %s3068_s0 }
 0x653   :  { %v2719_v14 = vpop.f32.mrf.mxu0 }
 0x6bc   :  { %v646_v16 = vpop.permute.xlu1 %645 }
 0x6bd   :  { %v654_v18 = vsel %vm166_vm2, %v3313_v13, %v646_v16  ;;  %v661_v13 = vlaneseq }
 0x6be   :  { %2729 = vmatmul.mubr.msk.f32.vlgmr.msra.gmra.mxu1 %vm64_vm1, %v654_v18 }
 0x6bf   :  { %2731 = vmatprep.mubr.msk.f32.mxu1 %vm3062_vm0, %v3061_v0  ;;  %v3390_v25 = vshrl.u32 %v661_v13, 7  ;;  %2755 = vmatpush3.msra.mxu1 %v922_v61 }
 0x6c0   :  { %v648_v20 = vpop.permute.xlu0 %647  ;;  %2756 = vmatprep.subr.mxu1 %v3061_v0 }
 0x6c1   :  { %v655_v21 = vsel %vm166_vm2, %v3316_v19, %v648_v20  ;;  %v663_v27 = vsub.s32 0, %v3390_v25  ;;  %v3396_v19 = vld [vmem:[%s3914_s5] sm:$0x3f]  ;;  %2757 = vmatpush3.msra.mxu1 %v921_v62  ;;  %v807_v13 = vsub.s32 2, %v3390_v25 }
 0x6c2   :  { %2732 = vmatmul.mubr.msk.f32.gmra.mxu1 %vm64_vm1, %v655_v21  ;;  %2758 = vmatprep.subr.mxu1 %v3061_v0 }
 0x6c3   :  { %2734 = vmatprep.mubr.msk.f32.mxu1 %vm3062_vm0, %v3061_v0  ;;  %v664_v29 = vrot.slane %v3396_v19, %v663_v27  ;;  %2759 = vmatpush3.msra.mxu1 %v920_v1 }
 0x6c4   :  { %v650_v22 = vpop.permute.xlu1 %649  ;;  %2760 = vmatprep.subr.mxu1 %v3061_v0 }
 0x6c5   :  { %v656_v23 = vsel %vm166_vm2, %v3319_v26, %v650_v22  ;;  %2761 = vmatpush3.msra.mxu1 %v919_v2 }
 0x6c6   :  { %2735 = vmatmul.mubr.msk.f32.gmra.mxu1 %vm64_vm1, %v656_v23  ;;  %2762 = vmatprep.subr.mxu1 %v3061_v0  ;;  %v800_v23 = vsub.s32 1, %v3390_v25 }
 0x6c7   :  { %2770 = vmatprep.mubr.msk.f32.mxu1 %vm3062_vm0, %v3061_v0  ;;  %2763 = vmatpush3.msra.mxu1 %v918_v4 }
 0x6c8   :  { %2764 = vmatprep.subr.mxu1 %v3061_v0 }
 0x77e   :  { %v740_v26 = vpop.f32.mrf.mxu1 }
 0x77f   :  { %v741_v30 = vadd.f32 %v740_v26, %v664_v29 }
 0x780   :  { %v2730_v31 = vpop.f32.mrf.mxu1 }
 0x781   :  { %v754_v32 = vadd.f32 %v741_v30, %v3164_v5  ;;  %v808_v31 = vrot.slane %v3396_v19, %v807_v13 }
 0x782   :  { %v745_v34 = vpop.f32.mrf.mxu1 }
 0x783   :  { %v746_v35 = vadd.f32 %v745_v34, %v664_v29  ;;  %v757_v36 = vsel %vm64_vm1, %v754_v32, 0.0 }
 0x784   :  { %758 = vadd.xlane.f32.xlu0 %v757_v36  ;;  %v2733_v37 = vpop.f32.mrf.mxu1 }
 0x785   :  { %v755_v38 = vadd.f32 %v746_v35, %v3175_v6 }
 0x786   :  { %v750_v39 = vpop.f32.mrf.mxu1 }
 0x787   :  { %v751_v40 = vadd.f32 %v750_v39, %v664_v29  ;;  %v760_v41 = vsel %vm64_vm1, %v755_v38, 0.0  ;;  %v801_v29 = vrot.slane %v3396_v19, %v800_v23 }
 0x788   :  { %761 = vadd.xlane.f32.xlu1 %v760_v41  ;;  %v2736_v42 = vpop.f32.mrf.mxu1 }
 0x789   :  { %v756_v43 = vadd.f32 %v751_v40, %v3184_v7 }
 0x78b   :  { %v764_v44 = vsel %vm763_vm6, %v756_v43, 0.0 }
 0x78c   :  { %765 = vadd.xlane.f32.xlu0 %v764_v44  ;;  %v916_v44 = vld [vmem:[%s3916_s8 + $0x8] sm:$0xff] }
 0x80d   :  { %v759_v5 = vpop.xlane.xlu0 %758 }
 0x80e   :  { %v768_v45 = vmul.f32 0.03125, %v759_v5  ;;  %v915_v5 = vld [vmem:[%s3916_s8] sm:$0xff] }
 0x810   :  { %v771_v46 = vsub.f32 %v754_v32, %v768_v45  ;;  %v2442_v45 = vld [vmem:[%s3917_s7] ss:$0 sm:$0xff] }
 0x811   :  { %v762_v47 = vpop.xlane.xlu1 %761 }
 0x812   :  { %v769_v48 = vmul.f32 0.03125, %v762_v47  ;;  %v774_v49 = vmul.f32 %v771_v46, %v771_v46 }
 0x814   :  { %v772_v50 = vsub.f32 %v755_v38, %v769_v48  ;;  %v777_v6 = vsel %vm64_vm1, %v774_v49, 0.0 }
 0x815   :  { %778 = vadd.xlane.f32.xlu0 %v777_v6  ;;  %v766_v10 = vpop.xlane.xlu0 %765 }
 0x816   :  { %v770_v15 = vmul.f32 0.03125, %v766_v10  ;;  %v775_v51 = vmul.f32 %v772_v50, %v772_v50 }
 0x818   :  { %v773_v52 = vsub.f32 %v756_v43, %v770_v15  ;;  %v780_v53 = vsel %vm64_vm1, %v775_v51, 0.0  ;;  %v917_v43 = vld [vmem:[%s3916_s8 + $0x10] sm:$0xff] }
 0x819   :  { %781 = vadd.xlane.f32.xlu1 %v780_v53  ;;  %2765 = vmatpush3.msra.mxu1 %v917_v43  ;;  %v2452_v43 = vld [vmem:[%s3909_s2 + $0x30] sm:$0xff] }
 0x81a   :  { %v776_v7 = vmul.f32 %v773_v52, %v773_v52  ;;  %2766 = vmatprep.subr.mxu1 %v3061_v0 }
 0x81b   :  { %2767 = vmatpush3.msra.mxu1 %v916_v44  ;;  %v2451_v44 = vld [vmem:[%s3909_s2 + $0x28] sm:$0xff] }
 0x81c   :  { %v783_v54 = vsel %vm763_vm6, %v776_v7, 0.0  ;;  %2768 = vmatprep.subr.mxu1 %v3061_v0 }
 0x81d   :  { %784 = vadd.xlane.f32.xlu0 %v783_v54  ;;  %2769 = vmatpush3.msra.mxu1 %v915_v5  ;;  %v925_v54 = vsub.s32 3, %v3390_v25  ;;  %v2450_v5 = vld [vmem:[%s3909_s2 + $0x20] sm:$0xff] }
 0x81e   :  { %2796 = vmatprep.subr.mxu1 %v3061_v0 }
 0x81f   :  { %v926_v17 = vrot.slane %v3396_v19, %v925_v54 }
 0x89e   :  { %v779_v8 = vpop.xlane.xlu0 %778 }
 0x89f   :  { %v786_v9 = vmul.f32 0.03125, %v779_v8 }
 0x8a1   :  { %v789_v11 = vadd.f32 1e-05, %v786_v9 }
 0x8a2   :  { %v782_v14 = vpop.xlane.xlu1 %781 }
 0x8a3   :  { %2989 = vrsqrt.f32 %v789_v11  ;;  %v787_v16 = vmul.f32 0.03125, %v782_v14 }
 0x8a5   :  { %v790_v18 = vadd.f32 1e-05, %v787_v16 }
 0x8a6   :  { %v785_v20 = vpop.xlane.xlu0 %784 }
 0x8a7   :  { %2991 = vrsqrt.f32 %v790_v18  ;;  %v788_v21 = vmul.f32 0.03125, %v785_v20 }
 0x8a9   :  { %v791_v22 = vadd.f32 1e-05, %v788_v21 }
 0x8ab   :  { %2993 = vrsqrt.f32 %v791_v22 }
 0x8b0   :  { %v2990_v26 = vpop.eup %2989 }
 0x8b1   :  { %v795_v30 = vmul.f32 %v2990_v26, %v771_v46 }
 0x8b3   :  { %v802_v32 = vmul.f32 %v801_v29, %v795_v30 }
 0x8b4   :  { %v2992_v34 = vpop.eup %2991 }
 0x8b5   :  { %v809_v35 = vadd.f32 %v808_v31, %v802_v32  ;;  %v796_v36 = vmul.f32 %v2992_v34, %v772_v50 }
 0x8b7   :  { %2746 = vmatmul.mubr.msk.f32.vlgmr.msra.gmra.mxu0 %vm64_vm1, %v809_v35  ;;  %v803_v37 = vmul.f32 %v801_v29, %v796_v36 }
 0x8b8   :  { %v2994_v38 = vpop.eup %2993  ;;  %2748 = vmatprep.mubr.msk.f32.mxu0 %vm3062_vm0, %v3061_v0 }
 0x8b9   :  { %v810_v39 = vadd.f32 %v808_v31, %v803_v37  ;;  %v797_v40 = vmul.f32 %v2994_v38, %v773_v52 }
 0x8bb   :  { %2749 = vmatmul.mubr.msk.f32.gmra.mxu0 %vm64_vm1, %v810_v39  ;;  %v804_v41 = vmul.f32 %v801_v29, %v797_v40 }
 0x8bc   :  { %2751 = vmatprep.mubr.msk.f32.mxu0 %vm3062_vm0, %v3061_v0 }
 0x8bd   :  { %v811_v42 = vadd.f32 %v808_v31, %v804_v41 }
 0x8bf   :  { %2752 = vmatmul.mubr.msk.f32.gmra.mxu0 %vm64_vm1, %v811_v42 }
 0x8c0   :  { %2787 = vmatprep.mubr.msk.f32.mxu0 %vm3062_vm0, %v3061_v0 }
 0x977   :  { %v898_v46 = vpop.f32.mrf.mxu0 }
 0x978   :  { %v899_v47 = vadd.f32 %v2442_v45, %v898_v46 }
 0x979   :  { %v2747_v48 = vpop.f32.mrf.mxu0 }
 0x97a   :  { %v912_v49 = vmax.f32 %v899_v47, 0.0 }
 0x97b   :  { %v903_v50 = vpop.f32.mrf.mxu0 }
 0x97c   :  { %v904_v6 = vadd.f32 %v2442_v45, %v903_v50  ;;  %2771 = vmatmul.mubr.msk.f32.vlgmr.msra.gmra.mxu1 %vm927_vm7, %v912_v49 }
 0x97d   :  { %v2750_v10 = vpop.f32.mrf.mxu0  ;;  %2773 = vmatprep.mubr.msk.f32.mxu1 %vm3062_vm0, %v3061_v0 }
 0x97e   :  { %v913_v15 = vmax.f32 %v904_v6, 0.0 }
 0x97f   :  { %v908_v51 = vpop.f32.mrf.mxu0 }
 0x980   :  { %v909_v52 = vadd.f32 %v2442_v45, %v908_v51  ;;  %2774 = vmatmul.mubr.msk.f32.gmra.mxu1 %vm927_vm7, %v913_v15  ;;  %v1061_v51 = vsub.s32 4, %v3390_v25 }
 0x981   :  { %v2753_v53 = vpop.f32.mrf.mxu0  ;;  %2776 = vmatprep.mubr.msk.f32.mxu1 %vm3062_vm0, %v3061_v0 }
 0x982   :  { %v914_v7 = vmax.f32 %v909_v52, 0.0  ;;  %v1068_v52 = vsub.s32 5, %v3390_v25  ;;  %v1062_v53 = vrot.slane %v3396_v19, %v1061_v51 }
 0x984   :  { %2777 = vmatmul.mubr.msk.f32.gmra.mxu1 %vm927_vm7, %v914_v7 }
 0x985   :  { %2802 = vmatprep.mubr.msk.f32.mxu1 %vm3062_vm0, %v3061_v0 }
 0xa3c   :  { %v1003_v56 = vpop.f32.mrf.mxu1 }
 0xa3d   :  { %v1004_v58 = vadd.f32 %v1003_v56, %v926_v17  ;;  %v1069_v56 = vrot.slane %v3396_v19, %v1068_v52 }
 0xa3e   :  { %v2772_v60 = vpop.f32.mrf.mxu1 }
 0xa3f   :  { %v1017_v61 = vadd.f32 %v1004_v58, %v809_v35 }
 0xa40   :  { %v1008_v62 = vpop.f32.mrf.mxu1 }
 0xa41   :  { %v1009_v1 = vadd.f32 %v1008_v62, %v926_v17  ;;  %v1020_v2 = vsel %vm64_vm1, %v1017_v61, 0.0 }
 0xa42   :  { %1021 = vadd.xlane.f32.xlu1 %v1020_v2  ;;  %v2775_v4 = vpop.f32.mrf.mxu1 }
 0xa43   :  { %v1018_v8 = vadd.f32 %v1009_v1, %v810_v39 }
 0xa44   :  { %v1013_v9 = vpop.f32.mrf.mxu1 }
 0xa45   :  { %v1014_v11 = vadd.f32 %v1013_v9, %v926_v17  ;;  %v1023_v14 = vsel %vm64_vm1, %v1018_v8, 0.0 }
 0xa46   :  { %1024 = vadd.xlane.f32.xlu0 %v1023_v14  ;;  %v2778_v16 = vpop.f32.mrf.mxu1 }
 0xa47   :  { %v1019_v18 = vadd.f32 %v1014_v11, %v811_v42  ;;  %v2453_v42 = vld [vmem:[%s3909_s2 + $0x38] sm:$0xff]  ;;  %v2455_v16 = vld [vmem:[%s3911_s3 + $0x1] ss:$0 sm:$0xff] }
 0xa48   :  { %2780 = vmatpush3.msra.mxu0 %v2453_v42 }
 0xa49   :  { %v1026_v20 = vsel %vm763_vm6, %v1019_v18, 0.0  ;;  %2781 = vmatprep.subr.mxu0 %v3061_v0 }
 0xa4a   :  { %1027 = vadd.xlane.f32.xlu1 %v1026_v20  ;;  %2782 = vmatpush3.msra.mxu0 %v2452_v43 }
 0xa4b   :  { %2783 = vmatprep.subr.mxu0 %v3061_v0 }
 0xa4c   :  { %2784 = vmatpush3.msra.mxu0 %v2451_v44 }
 0xa4d   :  { %2785 = vmatprep.subr.mxu0 %v3061_v0 }
 0xa4e   :  { %2786 = vmatpush3.msra.mxu0 %v2450_v5 }
 0xa4f   :  { %2811 = vmatprep.subr.mxu0 %v3061_v0 }
 0xacb   :  { %v1022_v21 = vpop.xlane.xlu1 %1021 }
 0xacc   :  { %v1029_v22 = vmul.f32 0.03125, %v1022_v21 }
 0xace   :  { %v1032_v29 = vsub.f32 %v1017_v61, %v1029_v22 }
 0xacf   :  { %v1025_v26 = vpop.xlane.xlu0 %1024 }
 0xad0   :  { %v1030_v30 = vmul.f32 0.03125, %v1025_v26  ;;  %v1035_v31 = vmul.f32 %v1032_v29, %v1032_v29 }
 0xad2   :  { %v1033_v32 = vsub.f32 %v1018_v8, %v1030_v30  ;;  %v1038_v34 = vsel %vm64_vm1, %v1035_v31, 0.0 }
 0xad3   :  { %1039 = vadd.xlane.f32.xlu0 %v1038_v34  ;;  %v1028_v35 = vpop.xlane.xlu1 %1027 }
 0xad4   :  { %v1031_v36 = vmul.f32 0.03125, %v1028_v35  ;;  %v1036_v37 = vmul.f32 %v1033_v32, %v1033_v32 }
 0xad6   :  { %v1034_v38 = vsub.f32 %v1019_v18, %v1031_v36  ;;  %v1041_v39 = vsel %vm64_vm1, %v1036_v37, 0.0 }
 0xad7   :  { %1042 = vadd.xlane.f32.xlu1 %v1041_v39 }
 0xad8   :  { %v1037_v40 = vmul.f32 %v1034_v38, %v1034_v38 }
 0xada   :  { %v1044_v41 = vsel %vm763_vm6, %v1037_v40, 0.0 }
 0xadb   :  { %1045 = vadd.xlane.f32.xlu0 %v1044_v41 }
 0xb5c   :  { %v1040_v45 = vpop.xlane.xlu0 %1039 }
 0xb5d   :  { %v1047_v46 = vmul.f32 0.03125, %v1040_v45 }
 0xb5f   :  { %v1050_v47 = vadd.f32 1e-05, %v1047_v46 }
 0xb60   :  { %v1043_v48 = vpop.xlane.xlu1 %1042 }
 0xb61   :  { %2995 = vrsqrt.f32 %v1050_v47  ;;  %v1048_v49 = vmul.f32 0.03125, %v1043_v48 }
 0xb63   :  { %v1051_v50 = vadd.f32 1e-05, %v1048_v49 }
 0xb64   :  { %v1046_v6 = vpop.xlane.xlu0 %1045 }
 0xb65   :  { %2997 = vrsqrt.f32 %v1051_v50  ;;  %v1049_v10 = vmul.f32 0.03125, %v1046_v6 }
 0xb67   :  { %v1052_v15 = vadd.f32 1e-05, %v1049_v10 }
 0xb69   :  { %2999 = vrsqrt.f32 %v1052_v15 }
 0xb6e   :  { %v2996_v7 = vpop.eup %2995 }
 0xb6f   :  { %v1056_v17 = vmul.f32 %v2996_v7, %v1032_v29 }
 0xb71   :  { %v1063_v58 = vmul.f32 %v1062_v53, %v1056_v17 }
 0xb72   :  { %v2998_v60 = vpop.eup %2997 }
 0xb73   :  { %v3521_v61 = vadd.f32 %v1069_v56, %v1063_v58  ;;  %v1057_v62 = vmul.f32 %v2998_v60, %v1033_v32 }
 0xb75   :  { %2788 = vmatmul.mubr.msk.f32.vlgmr.msra.gmra.mxu0 %vm64_vm1, %v3521_v61  ;;  %v1064_v1 = vmul.f32 %v1062_v53, %v1057_v62 }
 0xb76   :  { %v3000_v2 = vpop.eup %2999  ;;  %2790 = vmatprep.mubr.msk.f32.mxu0 %vm3062_vm0, %v3061_v0 }
 0xb77   :  { %v3527_v4 = vadd.f32 %v1069_v56, %v1064_v1  ;;  %v1058_v8 = vmul.f32 %v3000_v2, %v1034_v38 }
 0xb79   :  { %2791 = vmatmul.mubr.msk.f32.gmra.mxu0 %vm64_vm1, %v3527_v4  ;;  %v1065_v19 = vmul.f32 %v1062_v53, %v1058_v8 }
 0xb7a   :  { %2793 = vmatprep.mubr.msk.f32.mxu0 %vm3062_vm0, %v3061_v0 }
 0xb7b   :  { %v3533_v9 = vadd.f32 %v1069_v56, %v1065_v19 }
 0xb7d   :  { %2794 = vmatmul.mubr.msk.f32.gmra.mxu0 %vm64_vm1, %v3533_v9 }
 0xb7e   :  { %2817 = vmatprep.mubr.msk.f32.mxu0 %vm3062_vm0, %v3061_v0 }
 0xc35   :  { %v1163_v11 = vpop.f32.mrf.mxu0 }
 0xc36   :  { %v3546_v29 = vadd.f32 %v2455_v16, %v1163_v11 }
 0xc37   :  { %v2789_v14 = vpop.f32.mrf.mxu0 }
 0xc38   :  { %v1177_v31 = vmul.f32 0.25, %v3546_v29 }
 0xc39   :  { %v1168_v18 = vpop.f32.mrf.mxu0 }
 0xc3a   :  { %v3542_v20 = vadd.f32 %v2455_v16, %v1168_v18 }
 0xc3b   :  { %v2792_v21 = vpop.f32.mrf.mxu0 }
 0xc3c   :  { %1185 = vrot.lane.b32.xlu0 %v3542_v20, %s3063_s24  ;;  %v1178_v34 = vmul.f32 0.25, %v3542_v20 }
 0xc3d   :  { %v1173_v22 = vpop.f32.mrf.mxu0 }
 0xc3e   :  { %v3548_v26 = vadd.f32 %v2455_v16, %v1173_v22 }
 0xc3f   :  { %v2795_v30 = vpop.f32.mrf.mxu0 }
 0xc40   :  { %1427 = vrot.lane.b32.xlu0 %v3542_v20, %s3065_s1  ;;  %1187 = vrot.lane.b32.xlu1 %v3548_v26, %s3063_s24  ;;  %v1179_v32 = vmul.f32 0.25, %v3548_v26 }
 0xc44   :  { %1419 = vrot.lane.b32.xlu0 %v1177_v31, %s3066_s14  ;;  %1183 = vrot.lane.b32.xlu1 %v3546_v29, %s3063_s24 }
 0xc48   :  { %1429 = vrot.lane.b32.xlu1 %v3548_v26, %s3065_s1  ;;  %1423 = vrot.lane.b32.xlu0 %v1179_v32, %s3066_s14 }
 0xc4c   :  { %1425 = vrot.lane.b32.xlu1 %v3546_v29, %s3065_s1 }
 0xc50   :  { %1421 = vrot.lane.b32.xlu1 %v1178_v34, %s3066_s14 }
 0xcae   :  { %v1186_v36 = vpop.permute.xlu0 %1185 }
 0xcb2   :  { %v1188_v35 = vpop.permute.xlu1 %1187  ;;  %v1428_v39 = vpop.permute.xlu0 %1427 }
 0xcb3   :  { %2797 = vmatpush3.xpose.msk.msra.mxu1 %vm166_vm2, %v1188_v35 }
 0xcb4   :  { %2798 = vmatprep.subr.mxu1 %v3061_v0 }
 0xcb6   :  { %v1184_v37 = vpop.permute.xlu1 %1183  ;;  %v1420_v41 = vpop.permute.xlu0 %1419 }
 0xcb7   :  { %2799 = vmatpush3.xpose.msk.msra.mxu1 %vm166_vm2, %v1186_v36 }
 0xcb8   :  { %2800 = vmatprep.subr.mxu1 %v3061_v0 }
 0xcba   :  { %v1430_v38 = vpop.permute.xlu1 %1429  ;;  %v1424_v43 = vpop.permute.xlu0 %1423 }
 0xcbb   :  { %2801 = vmatpush3.xpose.msk.msra.mxu1 %vm166_vm2, %v1184_v37 }
 0xcbc   :  { %2826 = vmatprep.subr.mxu1 %v3061_v0 }
 0xcbe   :  { %2803 = vmatmul.mubr.msk.f32.vlgmr.msra.gmra.mxu1 %vm166_vm2, %v1177_v31  ;;  %v1426_v40 = vpop.permute.xlu1 %1425 }
 0xcbf   :  { %2827 = vmatpush3.xpose.msk.msra.mxu1 %vm166_vm2, %v1430_v38  ;;  %2805 = vmatprep.mubr.msk.f32.mxu1 %vm3062_vm0, %v3061_v0 }
 0xcc0   :  { %2828 = vmatprep.subr.mxu1 %v3061_v0 }
 0xcc2   :  { %2806 = vmatmul.mubr.msk.f32.gmra.mxu1 %vm166_vm2, %v1178_v34  ;;  %v1422_v42 = vpop.permute.xlu1 %1421 }
 0xcc3   :  { %2829 = vmatpush3.xpose.msk.msra.mxu1 %vm166_vm2, %v1428_v39  ;;  %2808 = vmatprep.mubr.msk.f32.mxu1 %vm3062_vm0, %v3061_v0 }
 0xcc4   :  { %2830 = vmatprep.subr.mxu1 %v3061_v0 }
 0xcc6   :  { %2809 = vmatmul.mubr.msk.f32.gmra.mxu1 %vm166_vm2, %v1179_v32 }
 0xcc7   :  { %2831 = vmatpush3.xpose.msk.msra.mxu1 %vm166_vm2, %v1426_v40  ;;  %2832 = vmatprep.mubr.msk.f32.mxu1 %vm3062_vm0, %v3061_v0 }
 0xcc8   :  { %2856 = vmatprep.subr.mxu1 %v3061_v0 }
 0xcca   :  { %2833 = vmatmul.mubr.msk.f32.vlgmr.msra.gmra.mxu1 %vm166_vm2, %v1420_v41 }
 0xccb   :  { %2835 = vmatprep.mubr.msk.f32.mxu1 %vm3062_vm0, %v3061_v0 }
 0xcce   :  { %2836 = vmatmul.mubr.msk.f32.gmra.mxu1 %vm166_vm2, %v1422_v42 }
 0xccf   :  { %2838 = vmatprep.mubr.msk.f32.mxu1 %vm3062_vm0, %v3061_v0 }
 0xcd2   :  { %2839 = vmatmul.mubr.msk.f32.gmra.mxu1 %vm166_vm2, %v1424_v43 }
 0xcd3   :  { %2864 = vmatprep.mubr.msk.f32.mxu1 %vm3062_vm0, %v3061_v0 }
 0xd7e   :  { %v1270_v44 = vpop.f32.mrf.mxu1 }
 0xd7f   :  { %v1271_v5 = vadd.f32 %v1270_v44, %v3232_v24 }
 0xd80   :  { %v2804_v45 = vpop.f32.mrf.mxu1 }
 0xd81   :  { %v1284_v46 = vsel %vm262_vm3, %v1271_v5, -inf }
 0xd82   :  { %1285 = vmax.xlane.f32.xlu1 %v1284_v46  ;;  %v1275_v47 = vpop.f32.mrf.mxu1 }
 0xd83   :  { %v1276_v48 = vadd.f32 %v1275_v47, %v3238_v28 }
 0xd84   :  { %v2807_v49 = vpop.f32.mrf.mxu1 }
 0xd85   :  { %v1287_v50 = vsel %vm262_vm3, %v1276_v48, -inf }
 0xd86   :  { %1288 = vmax.xlane.f32.xlu0 %v1287_v50  ;;  %v1280_v6 = vpop.f32.mrf.mxu1 }
 0xd87   :  { %v1281_v10 = vadd.f32 %v1280_v6, %v3245_v33 }
 0xd88   :  { %v2810_v15 = vpop.f32.mrf.mxu1 }
 0xd89   :  { %v1290_v53 = vsel %vm269_vm4, %v1281_v10, -inf }
 0xd8a   :  { %1291 = vmax.xlane.f32.xlu0 %v1290_v53  ;;  %v1509_v7 = vpop.f32.mrf.mxu1 }
 0xd8b   :  { %v1510_v17 = vadd.f32 %v1509_v7, %v3232_v24 }
 0xd8c   :  { %v2834_v56 = vpop.f32.mrf.mxu1 }
 0xd8d   :  { %v1523_v58 = vsel %vm262_vm3, %v1510_v17, -inf }
 0xd8e   :  { %1524 = vmax.xlane.f32.xlu1 %v1523_v58  ;;  %v1514_v60 = vpop.f32.mrf.mxu1 }
 0xd8f   :  { %v1515_v62 = vadd.f32 %v1514_v60, %v3238_v28 }
 0xd90   :  { %v2837_v1 = vpop.f32.mrf.mxu1 }
 0xd91   :  { %v1526_v2 = vsel %vm262_vm3, %v1515_v62, -inf }
 0xd92   :  { %1527 = vmax.xlane.f32.xlu0 %v1526_v2  ;;  %v1519_v8 = vpop.f32.mrf.mxu1 }
 0xd93   :  { %v1520_v19 = vadd.f32 %v1519_v8, %v3245_v33 }
 0xd94   :  { %v2840_v11 = vpop.f32.mrf.mxu1 }
 0xd95   :  { %v1529_v14 = vsel %vm269_vm4, %v1520_v19, -inf }
 0xd96   :  { %1530 = vmax.xlane.f32.xlu1 %v1529_v14 }
 0xda7   :  { %1322 = vrot.lane.b32.xlu1 %v3542_v20, %s3064_s30 }
 0xda8   :  { %1324 = vrot.lane.b32.xlu0 %v3548_v26, %s3064_s30 }
 0xdab   :  { %1320 = vrot.lane.b32.xlu1 %v3546_v29, %s3064_s30 }
 0xdac   :  { %1563 = vrot.lane.b32.xlu0 %v3548_v26, %s3067_s15 }
 0xe0b   :  { %v1286_v24 = vpop.xlane.xlu1 %1285 }
 0xe0c   :  { %v1293_v28 = vsub.f32 %v1271_v5, %v1286_v24 }
 0xe0e   :  { %v1296_v16 = vmul.f32 1.442695, %v1293_v28 }
 0xe0f   :  { %v1289_v33 = vpop.xlane.xlu0 %1288 }
 0xe10   :  { %3001 = vpow2.f32 %v1296_v16  ;;  %v1294_v18 = vsub.f32 %v1276_v48, %v1289_v33 }
 0xe12   :  { %v1298_v21 = vmul.f32 1.442695, %v1294_v18 }
 0xe13   :  { %v1292_v22 = vpop.xlane.xlu0 %1291 }
 0xe14   :  { %3003 = vpow2.f32 %v1298_v21  ;;  %v1295_v30 = vsub.f32 %v1281_v10, %v1292_v22 }
 0xe16   :  { %v1300_v31 = vmul.f32 1.442695, %v1295_v30 }
 0xe17   :  { %v1525_v32 = vpop.xlane.xlu1 %1524 }
 0xe18   :  { %3005 = vpow2.f32 %v1300_v31  ;;  %v1532_v34 = vsub.f32 %v1510_v17, %v1525_v32 }
 0xe1a   :  { %v1535_v35 = vmul.f32 1.442695, %v1532_v34  ;;  %v2482_v34 = vld [vmem:[%s3913_s4 + $0x38] sm:$0xff] }
 0xe1b   :  { %v1528_v36 = vpop.xlane.xlu0 %1527  ;;  %2857 = vmatpush3.msra.mxu1 %v2482_v34 }
 0xe1c   :  { %3007 = vpow2.f32 %v1535_v35  ;;  %v1533_v37 = vsub.f32 %v1515_v62, %v1528_v36  ;;  %v2481_v35 = vld [vmem:[%s3913_s4 + $0x30] sm:$0xff]  ;;  %2858 = vmatprep.subr.mxu1 %v3061_v0  ;;  %v2480_v36 = vld [vmem:[%s3913_s4 + $0x28] sm:$0xff] }
 0xe1d   :  { %v3002_v38 = vpop.eup %3001  ;;  %2859 = vmatpush3.msra.mxu1 %v2481_v35 }
 0xe1e   :  { %v1537_v26 = vmul.f32 1.442695, %v1533_v37  ;;  %v1302_v39 = vsel %vm262_vm3, %v3002_v38, 0.0  ;;  %2860 = vmatprep.subr.mxu1 %v3061_v0 }
 0xe1f   :  { %1303 = vadd.xlane.f32.xlu0 %v1302_v39  ;;  %v1325_v40 = vpop.permute.xlu0 %1324  ;;  %v1531_v41 = vpop.xlane.xlu1 %1530  ;;  %2861 = vmatpush3.msra.mxu1 %v2480_v36 }
 0xe20   :  { %3009 = vpow2.f32 %v1537_v26  ;;  %v1534_v42 = vsub.f32 %v1520_v19, %v1531_v41  ;;  %2812 = vmatpush3.msk.msra.mxu0 %vm317_vm5, %v1325_v40  ;;  %2862 = vmatprep.subr.mxu1 %v3061_v0 }
 0xe21   :  { %v3004_v43 = vpop.eup %3003  ;;  %2813 = vmatprep.subr.mxu0 %v3061_v0 }
 0xe22   :  { %v1539_v44 = vmul.f32 1.442695, %v1534_v42  ;;  %v1305_v5 = vsel %vm262_vm3, %v3004_v43, 0.0 }
 0xe23   :  { %1306 = vadd.xlane.f32.xlu1 %v1305_v5  ;;  %v1323_v45 = vpop.permute.xlu1 %1322  ;;  %v1564_v7 = vpop.permute.xlu0 %1563 }
 0xe24   :  { %3011 = vpow2.f32 %v1539_v44  ;;  %2814 = vmatpush3.msra.mxu0 %v1323_v45 }
 0xe25   :  { %v3006_v46 = vpop.eup %3005  ;;  %2815 = vmatprep.subr.mxu0 %v3061_v0 }
 0xe26   :  { %v1308_v47 = vsel %vm269_vm4, %v3006_v46, 0.0 }
 0xe27   :  { %1309 = vadd.xlane.f32.xlu0 %v1308_v47  ;;  %v1321_v48 = vpop.permute.xlu1 %1320 }
 0xe28   :  { %2816 = vmatpush3.msra.mxu0 %v1321_v48 }
 0xe29   :  { %v3008_v49 = vpop.eup %3007  ;;  %2841 = vmatprep.subr.mxu0 %v3061_v0 }
 0xe2a   :  { %v1541_v50 = vsel %vm262_vm3, %v3008_v49, 0.0 }
 0xe2b   :  { %1542 = vadd.xlane.f32.xlu1 %v1541_v50 }
 0xe2d   :  { %v3010_v6 = vpop.eup %3009 }
 0xe2e   :  { %v1544_v10 = vsel %vm262_vm3, %v3010_v6, 0.0 }
 0xe2f   :  { %1545 = vadd.xlane.f32.xlu0 %v1544_v10 }
 0xe31   :  { %v3012_v15 = vpop.eup %3011 }
 0xe32   :  { %v1547_v53 = vsel %vm269_vm4, %v3012_v15, 0.0 }
 0xe33   :  { %1548 = vadd.xlane.f32.xlu1 %v1547_v53  ;;  %v3692_v53 = vld [vmem:[%s3914_s5 + $0x8] sm:$0x3f] }
 0xe44   :  { %1561 = vrot.lane.b32.xlu1 %v3542_v20, %s3067_s15 }
 0xe45   :  { %1559 = vrot.lane.b32.xlu0 %v3546_v29, %s3067_s15 }
 0xea8   :  { %v1304_v17 = vpop.xlane.xlu0 %1303 }
 0xea9   :  { %3013 = vrcp.f32 %v1304_v17 }
 0xeac   :  { %v1307_v56 = vpop.xlane.xlu1 %1306 }
 0xead   :  { %3015 = vrcp.f32 %v1307_v56 }
 0xeb0   :  { %v1310_v58 = vpop.xlane.xlu0 %1309 }
 0xeb1   :  { %3017 = vrcp.f32 %v1310_v58 }
 0xeb4   :  { %v1543_v60 = vpop.xlane.xlu1 %1542 }
 0xeb5   :  { %3019 = vrcp.f32 %v1543_v60 }
 0xeb6   :  { %v3014_v62 = vpop.eup %3013 }
 0xeb7   :  { %v1314_v1 = vmul.f32 %v3014_v62, %v3002_v38  ;;  %v2479_v38 = vld [vmem:[%s3913_s4 + $0x20] sm:$0xff] }
 0xeb8   :  { %v1546_v2 = vpop.xlane.xlu0 %1545  ;;  %2863 = vmatpush3.msra.mxu1 %v2479_v38 }
 0xeb9   :  { %3021 = vrcp.f32 %v1546_v2  ;;  %2818 = vmatmul.mubr.msk.f32.vlgmr.msra.gmra.mxu0 %vm262_vm3, %v1314_v1  ;;  %2890 = vmatprep.subr.mxu1 %v3061_v0 }
 0xeba   :  { %v3016_v8 = vpop.eup %3015  ;;  %2842 = vmatpush3.msk.msra.mxu0 %vm317_vm5, %v1564_v7  ;;  %2820 = vmatprep.mubr.msk.f32.mxu0 %vm3062_vm0, %v3061_v0  ;;  %v1684_v7 = vrot.slane %v3692_v53, %v663_v27 }
 0xebb   :  { %v1315_v20 = vmul.f32 %v3016_v8, %v3004_v43  ;;  %2843 = vmatprep.subr.mxu0 %v3061_v0 }
 0xebc   :  { %v1549_v29 = vpop.xlane.xlu1 %1548  ;;  %v1560_v16 = vpop.permute.xlu0 %1559 }
 0xebd   :  { %3023 = vrcp.f32 %v1549_v29  ;;  %2821 = vmatmul.mubr.msk.f32.gmra.mxu0 %vm262_vm3, %v1315_v20 }
 0xebe   :  { %v3018_v19 = vpop.eup %3017  ;;  %2823 = vmatprep.mubr.msk.f32.mxu0 %vm3062_vm0, %v3061_v0 }
 0xebf   :  { %v1316_v11 = vmul.f32 %v3018_v19, %v3006_v46 }
 0xec0   :  { %v1562_v14 = vpop.permute.xlu1 %1561 }
 0xec1   :  { %2824 = vmatmul.mubr.msk.f32.gmra.mxu0 %vm262_vm3, %v1316_v11 }
 0xec2   :  { %v3020_v24 = vpop.eup %3019  ;;  %2844 = vmatpush3.msra.mxu0 %v1562_v14  ;;  %2847 = vmatprep.mubr.msk.f32.mxu0 %vm3062_vm0, %v3061_v0 }
 0xec3   :  { %v1553_v28 = vmul.f32 %v3020_v24, %v3008_v49  ;;  %2845 = vmatprep.subr.mxu0 %v3061_v0 }
 0xec4   :  { %2846 = vmatpush3.msra.mxu0 %v1560_v16 }
 0xec5   :  { %2848 = vmatmul.mubr.msk.f32.vlgmr.msra.gmra.mxu0 %vm262_vm3, %v1553_v28  ;;  %2873 = vmatprep.subr.mxu0 %v3061_v0  ;;  %v3644_v33 = vadd.f32 %v1553_v28, %v1314_v1 }
 0xec6   :  { %v3022_v18 = vpop.eup %3021  ;;  %2850 = vmatprep.mubr.msk.f32.mxu0 %vm3062_vm0, %v3061_v0 }
 0xec7   :  { %v1554_v21 = vmul.f32 %v3022_v18, %v3010_v6 }
 0xec9   :  { %2851 = vmatmul.mubr.msk.f32.gmra.mxu0 %vm262_vm3, %v1554_v21  ;;  %v3649_v22 = vadd.f32 %v1554_v21, %v1315_v20 }
 0xeca   :  { %v3024_v30 = vpop.eup %3023  ;;  %2853 = vmatprep.mubr.msk.f32.mxu0 %vm3062_vm0, %v3061_v0 }
 0xecb   :  { %v1555_v31 = vmul.f32 %v3024_v30, %v3012_v15 }
 0xecd   :  { %2854 = vmatmul.mubr.msk.f32.gmra.mxu0 %vm262_vm3, %v1555_v31  ;;  %v3654_v32 = vadd.f32 %v1555_v31, %v1316_v11 }
 0xece   :  { %2881 = vmatprep.mubr.msk.f32.mxu0 %vm3062_vm0, %v3061_v0 }
 0xf79   :  { %v1405_v37 = vpop.f32.mrf.mxu0 }
 0xf7b   :  { %v2819_v26 = vpop.f32.mrf.mxu0 }
 0xf7d   :  { %v1410_v39 = vpop.f32.mrf.mxu0 }
 0xf7f   :  { %v2822_v40 = vpop.f32.mrf.mxu0 }
 0xf80   :  { %v2488_v40 = vld [vmem:[%s3915_s6 + $0x30] sm:$0xff] }
 0xf81   :  { %v1415_v41 = vpop.f32.mrf.mxu0 }
 0xf83   :  { %v2825_v42 = vpop.f32.mrf.mxu0 }
 0xf84   :  { %v2486_v42 = vld [vmem:[%s3915_s6 + $0x20] sm:$0xff] }
 0xf85   :  { %v1644_v43 = vpop.f32.mrf.mxu0 }
 0xf86   :  { %1664 = vrot.lane.b32.xlu1 %v1644_v43, %s3068_s0  ;;  %v2502_v43 = vld [vmem:[%s3916_s8 + $0x78] sm:$0xff] }
 0xf87   :  { %v2849_v44 = vpop.f32.mrf.mxu0 }
 0xf88   :  { %v2501_v44 = vld [vmem:[%s3916_s8 + $0x70] sm:$0xff] }
 0xf89   :  { %v1649_v5 = vpop.f32.mrf.mxu0 }
 0xf8a   :  { %1666 = vrot.lane.b32.xlu0 %v1649_v5, %s3068_s0  ;;  %v2500_v5 = vld [vmem:[%s3916_s8 + $0x68] sm:$0xff] }
 0xf8b   :  { %v2852_v45 = vpop.f32.mrf.mxu0 }
 0xf8c   :  { %v2499_v45 = vld [vmem:[%s3916_s8 + $0x60] sm:$0xff] }
 0xf8d   :  { %v1654_v46 = vpop.f32.mrf.mxu0 }
 0xf8e   :  { %1668 = vrot.lane.b32.xlu1 %v1654_v46, %s3068_s0  ;;  %v2498_v46 = vld [vmem:[%s3916_s8 + $0x58] sm:$0xff] }
 0xf8f   :  { %v2855_v47 = vpop.f32.mrf.mxu0 }
 0xff8   :  { %v1665_v48 = vpop.permute.xlu1 %1664 }
 0xff9   :  { %v1673_v49 = vsel %vm166_vm2, %v1405_v37, %v1665_v48 }
 0xffa   :  { %2865 = vmatmul.mubr.msk.f32.vlgmr.msra.gmra.mxu1 %vm64_vm1, %v1673_v49 }
 0xffb   :  { %2867 = vmatprep.mubr.msk.f32.mxu1 %vm3062_vm0, %v3061_v0  ;;  %2891 = vmatpush3.msra.mxu1 %v2502_v43 }
 0xffc   :  { %v1667_v50 = vpop.permute.xlu0 %1666  ;;  %2892 = vmatprep.subr.mxu1 %v3061_v0 }
 0xffd   :  { %v1674_v6 = vsel %vm166_vm2, %v1410_v39, %v1667_v50  ;;  %v2489_v39 = vld [vmem:[%s3915_s6 + $0x38] sm:$0xff]  ;;  %2893 = vmatpush3.msra.mxu1 %v2501_v44 }
 0xffe   :  { %2868 = vmatmul.mubr.msk.f32.gmra.mxu1 %vm64_vm1, %v1674_v6  ;;  %2874 = vmatpush3.msra.mxu0 %v2489_v39 }
 0xfff   :  { %2870 = vmatprep.mubr.msk.f32.mxu1 %vm3062_vm0, %v3061_v0  ;;  %2875 = vmatprep.subr.mxu0 %v3061_v0 }
0x1000   :  { %v1669_v10 = vpop.permute.xlu1 %1668  ;;  %2876 = vmatpush3.msra.mxu0 %v2488_v40  ;;  %2894 = vmatprep.subr.mxu1 %v3061_v0 }
0x1001   :  { %v1675_v15 = vsel %vm166_vm2, %v1415_v41, %v1669_v10  ;;  %v2487_v41 = vld [vmem:[%s3915_s6 + $0x28] sm:$0xff]  ;;  %2877 = vmatprep.subr.mxu0 %v3061_v0  ;;  %2895 = vmatpush3.msra.mxu1 %v2500_v5 }
0x1002   :  { %2871 = vmatmul.mubr.msk.f32.gmra.mxu1 %vm64_vm1, %v1675_v15  ;;  %2878 = vmatpush3.msra.mxu0 %v2487_v41 }
0x1003   :  { %2906 = vmatprep.mubr.msk.f32.mxu1 %vm3062_vm0, %v3061_v0  ;;  %2879 = vmatprep.subr.mxu0 %v3061_v0 }
0x1004   :  { %2880 = vmatpush3.msra.mxu0 %v2486_v42  ;;  %2896 = vmatprep.subr.mxu1 %v3061_v0 }
0x1005   :  { %2915 = vmatprep.subr.mxu0 %v3061_v0  ;;  %2897 = vmatpush3.msra.mxu1 %v2499_v45 }
0x1006   :  { %2898 = vmatprep.subr.mxu1 %v3061_v0 }
0x1007   :  { %2899 = vmatpush3.msra.mxu1 %v2498_v46 }
0x1008   :  { %2900 = vmatprep.subr.mxu1 %v3061_v0 }
0x10ba   :  { %v1760_v17 = vpop.f32.mrf.mxu1 }
0x10bb   :  { %v1761_v56 = vadd.f32 %v1760_v17, %v1684_v7 }
0x10bc   :  { %v2866_v58 = vpop.f32.mrf.mxu1 }
0x10bd   :  { %v1774_v60 = vadd.f32 %v1761_v56, %v3521_v61  ;;  %v1819_v56 = vrot.slane %v3692_v53, %v800_v23 }
0x10be   :  { %v1765_v62 = vpop.f32.mrf.mxu1 }
0x10bf   :  { %v1766_v1 = vadd.f32 %v1765_v62, %v1684_v7  ;;  %v1777_v2 = vsel %vm64_vm1, %v1774_v60, 0.0  ;;  %v1826_v62 = vrot.slane %v3692_v53, %v807_v13 }
0x10c0   :  { %1778 = vadd.xlane.f32.xlu0 %v1777_v2  ;;  %v2869_v8 = vpop.f32.mrf.mxu1 }
0x10c1   :  { %v1775_v20 = vadd.f32 %v1766_v1, %v3527_v4 }
0x10c2   :  { %v1770_v29 = vpop.f32.mrf.mxu1 }
0x10c3   :  { %v1771_v19 = vadd.f32 %v1770_v29, %v1684_v7  ;;  %v1780_v11 = vsel %vm64_vm1, %v1775_v20, 0.0 }
0x10c4   :  { %1781 = vadd.xlane.f32.xlu1 %v1780_v11  ;;  %v2872_v14 = vpop.f32.mrf.mxu1 }
0x10c5   :  { %v1776_v27 = vadd.f32 %v1771_v19, %v3533_v9 }
0x10c7   :  { %v1783_v24 = vsel %vm763_vm6, %v1776_v27, 0.0 }
0x10c8   :  { %1784 = vadd.xlane.f32.xlu0 %v1783_v24  ;;  %v2496_v24 = vld [vmem:[%s3916_s8 + $0x48] sm:$0xff] }
0x1149   :  { %v1779_v61 = vpop.xlane.xlu0 %1778 }
0x114a   :  { %v1786_v28 = vmul.f32 0.03125, %v1779_v61  ;;  %v2495_v61 = vld [vmem:[%s3916_s8 + $0x40] sm:$0xff] }
0x114c   :  { %v1789_v16 = vsub.f32 %v1774_v60, %v1786_v28  ;;  %v2491_v28 = vld [vmem:[%s3917_s7 + $0x1] ss:$0 sm:$0xff] }
0x114d   :  { %v1782_v18 = vpop.xlane.xlu1 %1781 }
0x114e   :  { %v1787_v21 = vmul.f32 0.03125, %v1782_v18  ;;  %v1792_v30 = vmul.f32 %v1789_v16, %v1789_v16 }
0x1150   :  { %v1790_v31 = vsub.f32 %v1775_v20, %v1787_v21  ;;  %v1795_v4 = vsel %vm64_vm1, %v1792_v30, 0.0 }
0x1151   :  { %1796 = vadd.xlane.f32.xlu0 %v1795_v4  ;;  %v1785_v34 = vpop.xlane.xlu0 %1784 }
0x1152   :  { %v1788_v35 = vmul.f32 0.03125, %v1785_v34  ;;  %v1793_v36 = vmul.f32 %v1790_v31, %v1790_v31 }
0x1154   :  { %v1791_v37 = vsub.f32 %v1776_v27, %v1788_v35  ;;  %v1798_v38 = vsel %vm64_vm1, %v1793_v36, 0.0  ;;  %v2497_v27 = vld [vmem:[%s3916_s8 + $0x50] sm:$0xff] }
0x1155   :  { %1799 = vadd.xlane.f32.xlu1 %v1798_v38  ;;  %2901 = vmatpush3.msra.mxu1 %v2497_v27  ;;  %v2093_v27 = vld [vmem:[%s3918_s9] sm:$0xff] }
0x1156   :  { %v1794_v9 = vmul.f32 %v1791_v37, %v1791_v37  ;;  %2902 = vmatprep.subr.mxu1 %v3061_v0 }
0x1157   :  { %2903 = vmatpush3.msra.mxu1 %v2496_v24 }
0x1158   :  { %v1801_v26 = vsel %vm763_vm6, %v1794_v9, 0.0  ;;  %2904 = vmatprep.subr.mxu1 %v3061_v0 }
0x1159   :  { %1802 = vadd.xlane.f32.xlu0 %v1801_v26  ;;  %2905 = vmatpush3.msra.mxu1 %v2495_v61  ;;  %v1947_v26 = vrot.slane %v3692_v53, %v925_v54 }
0x11da   :  { %v1797_v47 = vpop.xlane.xlu0 %1796 }
0x11db   :  { %v1804_v48 = vmul.f32 0.03125, %v1797_v47 }
0x11dd   :  { %v1807_v49 = vadd.f32 1e-05, %v1804_v48 }
0x11de   :  { %v1800_v50 = vpop.xlane.xlu1 %1799 }
0x11df   :  { %3025 = vrsqrt.f32 %v1807_v49  ;;  %v1805_v6 = vmul.f32 0.03125, %v1800_v50 }
0x11e1   :  { %v1808_v10 = vadd.f32 1e-05, %v1805_v6 }
0x11e2   :  { %v1803_v15 = vpop.xlane.xlu0 %1802 }
0x11e3   :  { %3027 = vrsqrt.f32 %v1808_v10  ;;  %v1806_v7 = vmul.f32 0.03125, %v1803_v15 }
0x11e5   :  { %v1809_v17 = vadd.f32 1e-05, %v1806_v7 }
0x11e7   :  { %3029 = vrsqrt.f32 %v1809_v17 }
0x11ec   :  { %v3026_v58 = vpop.eup %3025 }
0x11ed   :  { %v1813_v60 = vmul.f32 %v3026_v58, %v1789_v16 }
0x11ef   :  { %v1820_v1 = vmul.f32 %v1819_v56, %v1813_v60 }
0x11f0   :  { %v3028_v2 = vpop.eup %3027 }
0x11f1   :  { %v1827_v8 = vadd.f32 %v1826_v62, %v1820_v1  ;;  %v1814_v20 = vmul.f32 %v3028_v2, %v1790_v31 }
0x11f3   :  { %2882 = vmatmul.mubr.msk.f32.vlgmr.msra.gmra.mxu0 %vm64_vm1, %v1827_v8  ;;  %v1821_v29 = vmul.f32 %v1819_v56, %v1814_v20 }
0x11f4   :  { %v3030_v19 = vpop.eup %3029  ;;  %2884 = vmatprep.mubr.msk.f32.mxu0 %vm3062_vm0, %v3061_v0 }
0x11f5   :  { %v1828_v11 = vadd.f32 %v1826_v62, %v1821_v29  ;;  %v1815_v14 = vmul.f32 %v3030_v19, %v1791_v37 }
0x11f7   :  { %2885 = vmatmul.mubr.msk.f32.gmra.mxu0 %vm64_vm1, %v1828_v11  ;;  %v1822_v23 = vmul.f32 %v1819_v56, %v1815_v14  ;;  %v2096_v14 = vld [vmem:[%s3918_s9 + $0x18] sm:$0xff] }
0x11f8   :  { %2887 = vmatprep.mubr.msk.f32.mxu0 %vm3062_vm0, %v3061_v0  ;;  %2916 = vmatpush3.msra.mxu0 %v2096_v14 }
0x11f9   :  { %v1829_v13 = vadd.f32 %v1826_v62, %v1822_v23  ;;  %2917 = vmatprep.subr.mxu0 %v3061_v0  ;;  %v2095_v23 = vld [vmem:[%s3918_s9 + $0x10] sm:$0xff] }
0x11fa   :  { %2918 = vmatpush3.msra.mxu0 %v2095_v23 }
0x11fb   :  { %2888 = vmatmul.mubr.msk.f32.gmra.mxu0 %vm64_vm1, %v1829_v13  ;;  %2919 = vmatprep.subr.mxu0 %v3061_v0 }
0x11fc   :  { %2923 = vmatprep.mubr.msk.f32.mxu0 %vm3062_vm0, %v3061_v0 }
0x12b3   :  { %v1918_v16 = vpop.f32.mrf.mxu0 }
0x12b4   :  { %v1919_v18 = vadd.f32 %v2491_v28, %v1918_v16 }
0x12b5   :  { %v2883_v21 = vpop.f32.mrf.mxu0 }
0x12b6   :  { %v1932_v30 = vmax.f32 %v1919_v18, 0.0 }
0x12b7   :  { %v1923_v31 = vpop.f32.mrf.mxu0 }
0x12b8   :  { %v1924_v4 = vadd.f32 %v2491_v28, %v1923_v31  ;;  %2907 = vmatmul.mubr.msk.f32.vlgmr.msra.gmra.mxu1 %vm927_vm7, %v1932_v30 }
0x12b9   :  { %v2886_v34 = vpop.f32.mrf.mxu0  ;;  %2909 = vmatprep.mubr.msk.f32.mxu1 %vm3062_vm0, %v3061_v0 }
0x12ba   :  { %v1933_v35 = vmax.f32 %v1924_v4, 0.0  ;;  %v2082_v34 = vrot.slane %v3692_v53, %v1061_v51 }
0x12bb   :  { %v1928_v36 = vpop.f32.mrf.mxu0 }
0x12bc   :  { %v1929_v37 = vadd.f32 %v2491_v28, %v1928_v36  ;;  %2910 = vmatmul.mubr.msk.f32.gmra.mxu1 %vm927_vm7, %v1933_v35 }
0x12bd   :  { %v2889_v38 = vpop.f32.mrf.mxu0  ;;  %2912 = vmatprep.mubr.msk.f32.mxu1 %vm3062_vm0, %v3061_v0 }
0x12be   :  { %v1934_v9 = vmax.f32 %v1929_v37, 0.0  ;;  %v2089_v37 = vrot.slane %v3692_v53, %v1068_v52  ;;  %v2254_v52 = vld [vmem:[%s3919_s11 + $0x18] sm:$0xff]  ;;  %v2253_v53 = vld [vmem:[%s3919_s11 + $0x10] sm:$0xff] }
0x12c0   :  { %2913 = vmatmul.mubr.msk.f32.gmra.mxu1 %vm927_vm7, %v1934_v9 }
0x1378   :  { %v2023_v39 = vpop.f32.mrf.mxu1 }
0x1379   :  { %v2024_v40 = vadd.f32 %v2023_v39, %v1947_v26 }
0x137a   :  { %v2908_v41 = vpop.f32.mrf.mxu1 }
0x137b   :  { %v2037_v42 = vadd.f32 %v2024_v40, %v1827_v8 }
0x137c   :  { %v2028_v43 = vpop.f32.mrf.mxu1 }
0x137d   :  { %v2029_v44 = vadd.f32 %v2028_v43, %v1947_v26  ;;  %v2040_v5 = vsel %vm64_vm1, %v2037_v42, 0.0 }
0x137e   :  { %2041 = vadd.xlane.f32.xlu1 %v2040_v5  ;;  %v2911_v45 = vpop.f32.mrf.mxu1  ;;  %v2251_v5 = vld [vmem:[%s3919_s11] sm:$0xff] }
0x137f   :  { %v2038_v46 = vadd.f32 %v2029_v44, %v1828_v11  ;;  %v2252_v44 = vld [vmem:[%s3919_s11 + $0x8] sm:$0xff]  ;;  %v2506_v45 = vld [vmem:[%s3920_s10] ss:$0 sm:$0xff]  ;;  %s3069_s10 = smov 65   ;;  %s3070_s11 = smov 85  }
0x1380   :  { %v2033_v47 = vpop.f32.mrf.mxu1 }
0x1381   :  { %v2034_v48 = vadd.f32 %v2033_v47, %v1947_v26  ;;  %v2043_v49 = vsel %vm64_vm1, %v2038_v46, 0.0 }
0x1382   :  { %2044 = vadd.xlane.f32.xlu0 %v2043_v49  ;;  %v2914_v50 = vpop.f32.mrf.mxu1 }
0x1383   :  { %v2039_v6 = vadd.f32 %v2034_v48, %v1829_v13  ;;  %v2094_v13 = vld [vmem:[%s3918_s9 + $0x8] sm:$0xff] }
0x1384   :  { %2920 = vmatpush3.msra.mxu0 %v2094_v13  ;;  %v538_v13 = vadd.f32 %v3344_v57, %v3287_v3  ;;  %v18_v3 = vstv %s3921_s12 }
0x1385   :  { %v2046_v54 = vsel %vm763_vm6, %v2039_v6, 0.0  ;;  %2921 = vmatprep.subr.mxu0 %v3061_v0  ;;  %19 = vst [vmem:[#allocation2] sm:$0x1] %v18_v3 }
0x1386   :  { %2047 = vadd.xlane.f32.xlu1 %v2046_v54  ;;  %2922 = vmatpush3.msra.mxu0 %v2093_v27  ;;  %v537_v27 = vadd.f32 %v3338_v55, %v3278_v63 }
0x1387   :  { %2932 = vmatprep.subr.mxu0 %v3061_v0 }
0x1407   :  { %v2042_v10 = vpop.xlane.xlu1 %2041 }
0x1408   :  { %v2049_v15 = vmul.f32 0.03125, %v2042_v10 }
0x140a   :  { %v2052_v7 = vsub.f32 %v2037_v42, %v2049_v15 }
0x140b   :  { %v2045_v17 = vpop.xlane.xlu0 %2044 }
0x140c   :  { %v2050_v56 = vmul.f32 0.03125, %v2045_v17  ;;  %v2055_v58 = vmul.f32 %v2052_v7, %v2052_v7 }
0x140e   :  { %v2053_v60 = vsub.f32 %v2038_v46, %v2050_v56  ;;  %v2058_v62 = vsel %vm64_vm1, %v2055_v58, 0.0 }
0x140f   :  { %2059 = vadd.xlane.f32.xlu0 %v2058_v62  ;;  %v2048_v1 = vpop.xlane.xlu1 %2047 }
0x1410   :  { %v2051_v2 = vmul.f32 0.03125, %v2048_v1  ;;  %v2056_v8 = vmul.f32 %v2053_v60, %v2053_v60 }
0x1412   :  { %v2054_v20 = vsub.f32 %v2039_v6, %v2051_v2  ;;  %v2061_v29 = vsel %vm64_vm1, %v2056_v8, 0.0 }
0x1413   :  { %2062 = vadd.xlane.f32.xlu1 %v2061_v29 }
0x1414   :  { %v2057_v19 = vmul.f32 %v2054_v20, %v2054_v20 }
0x1416   :  { %v2064_v11 = vsel %vm763_vm6, %v2057_v19, 0.0 }
0x1417   :  { %2065 = vadd.xlane.f32.xlu0 %v2064_v11 }
0x1498   :  { %v2060_v24 = vpop.xlane.xlu0 %2059 }
0x1499   :  { %v2067_v61 = vmul.f32 0.03125, %v2060_v24  ;;  %v640_v24 = vmul.f32 0.5, %v538_v13 }
0x149b   :  { %v2070_v28 = vadd.f32 1e-05, %v2067_v61  ;;  %v639_v61 = vmul.f32 0.5, %v537_v27 }
0x149c   :  { %v2063_v16 = vpop.xlane.xlu1 %2062 }
0x149d   :  { %3031 = vrsqrt.f32 %v2070_v28  ;;  %v2068_v18 = vmul.f32 0.03125, %v2063_v16  ;;  %v539_v28 = vadd.f32 %v3350_v59, %v3304_v12  ;;  %v1658_v16 = vmul.f32 0.5, %v3644_v33 }
0x149f   :  { %v2071_v21 = vadd.f32 1e-05, %v2068_v18  ;;  %v641_v18 = vmul.f32 0.5, %v539_v28 }
0x14a0   :  { %v2066_v30 = vpop.xlane.xlu0 %2065 }
0x14a1   :  { %3033 = vrsqrt.f32 %v2071_v21  ;;  %v2069_v31 = vmul.f32 0.03125, %v2066_v30 }
0x14a3   :  { %v2072_v4 = vadd.f32 1e-05, %v2069_v31 }
0x14a5   :  { %3035 = vrsqrt.f32 %v2072_v4 }
0x14aa   :  { %v3032_v35 = vpop.eup %3031 }
0x14ab   :  { %v2076_v36 = vmul.f32 %v3032_v35, %v2052_v7 }
0x14ad   :  { %v2083_v38 = vmul.f32 %v2082_v34, %v2076_v36 }
0x14ae   :  { %v3034_v9 = vpop.eup %3033 }
0x14af   :  { %v2090_v26 = vadd.f32 %v2089_v37, %v2083_v38  ;;  %v2077_v39 = vmul.f32 %v3034_v9, %v2053_v60 }
0x14b1   :  { %2924 = vmatmul.mubr.msk.f32.vlgmr.msra.gmra.mxu0 %vm64_vm1, %v2090_v26  ;;  %v2084_v40 = vmul.f32 %v2082_v34, %v2077_v39  ;;  %v2513_v39 = vld [vmem:[#allocation2] ss:$0 sm:$0xff] }
0x14b2   :  { %v3036_v41 = vpop.eup %3035  ;;  %2926 = vmatprep.mubr.msk.f32.mxu0 %vm3062_vm0, %v3061_v0  ;;  %2933 = vmatpush3.msra.mxu0 %v2254_v52 }
0x14b3   :  { %v2091_v42 = vadd.f32 %v2089_v37, %v2084_v40  ;;  %v2078_v43 = vmul.f32 %v3036_v41, %v2054_v20  ;;  %2934 = vmatprep.subr.mxu0 %v3061_v0 }
0x14b4   :  { %2935 = vmatpush3.msra.mxu0 %v2253_v53 }
0x14b5   :  { %2927 = vmatmul.mubr.msk.f32.gmra.mxu0 %vm64_vm1, %v2091_v42  ;;  %v2085_v51 = vmul.f32 %v2082_v34, %v2078_v43  ;;  %2936 = vmatprep.subr.mxu0 %v3061_v0 }
0x14b6   :  { %2929 = vmatprep.mubr.msk.f32.mxu0 %vm3062_vm0, %v3061_v0  ;;  %2937 = vmatpush3.msra.mxu0 %v2252_v44 }
0x14b7   :  { %v2092_v25 = vadd.f32 %v2089_v37, %v2085_v51  ;;  %2938 = vmatprep.subr.mxu0 %v3061_v0 }
0x14b8   :  { %2939 = vmatpush3.msra.mxu0 %v2251_v5 }
0x14b9   :  { %2930 = vmatmul.mubr.msk.f32.gmra.mxu0 %vm64_vm1, %v2092_v25  ;;  %v1659_v25 = vmul.f32 0.5, %v3649_v22 }
0x14ba   :  { %2940 = vmatprep.mubr.msk.f32.mxu0 %vm3062_vm0, %v3061_v0 }
0x1571   :  { %v2179_v46 = vpop.f32.mrf.mxu0 }
0x1572   :  { %v3836_v47 = vadd.f32 %v2506_v45, %v2179_v46 }
0x1573   :  { %v2925_v48 = vpop.f32.mrf.mxu0 }
0x1574   :  { %v2510_v49 = vmul.f32 -1.442695, %v3836_v47  ;;  %v2193_v23 = vsel %vm927_vm7, %v3836_v47, -inf }
0x1575   :  { %v2184_v50 = vpop.f32.mrf.mxu0 }
0x1576   :  { %3037 = vpow2.f32 %v2510_v49  ;;  %v3839_v6 = vadd.f32 %v2506_v45, %v2184_v50 }
0x1577   :  { %v2928_v54 = vpop.f32.mrf.mxu0 }
0x1578   :  { %v2511_v10 = vmul.f32 -1.442695, %v3839_v6  ;;  %v2196_v11 = vsel %vm927_vm7, %v3839_v6, -inf }
0x1579   :  { %v2189_v15 = vpop.f32.mrf.mxu0 }
0x157a   :  { %3039 = vpow2.f32 %v2511_v10  ;;  %v3842_v7 = vadd.f32 %v2506_v45, %v2189_v15  ;;  %v1660_v45 = vmul.f32 0.5, %v3654_v32 }
0x157b   :  { %v2931_v17 = vpop.f32.mrf.mxu0 }
0x157c   :  { %v2512_v56 = vmul.f32 -1.442695, %v3842_v7  ;;  %v2200_v14 = vsel %vm2199_vm8, %v3842_v7, -inf }
0x157e   :  { %3041 = vpow2.f32 %v2512_v56 }
0x1583   :  { %v3038_v58 = vpop.eup %3037 }
0x1584   :  { %v2242_v60 = vadd.f32 1.0, %v3038_v58 }
0x1586   :  { %3043 = vrcp.f32 %v2242_v60 }
0x1587   :  { %v3040_v62 = vpop.eup %3039 }
0x1588   :  { %v2243_v1 = vadd.f32 1.0, %v3040_v62 }
0x158a   :  { %3045 = vrcp.f32 %v2243_v1 }
0x158b   :  { %v3042_v2 = vpop.eup %3041 }
0x158c   :  { %v2244_v8 = vadd.f32 1.0, %v3042_v2 }
0x158e   :  { %3047 = vrcp.f32 %v2244_v8 }
0x1593   :  { %v3044_v20 = vpop.eup %3043 }
0x1594   :  { %2265 = vrot.lane.b32.xlu1 %v3044_v20, %s3064_s30 }
0x1597   :  { %v3046_v29 = vpop.eup %3045 }
0x1598   :  { %2267 = vrot.lane.b32.xlu0 %v3046_v29, %s3064_s30 }
0x159b   :  { %v3048_v19 = vpop.eup %3047 }
0x159c   :  { %2269 = vrot.lane.b32.xlu1 %v3048_v19, %s3064_s30 }
0x15b7   :  { %2197 = vmax.xlane.f32.xlu0 %v2196_v11 }
0x15bb   :  { %2201 = vmax.xlane.f32.xlu0 %v2200_v14 }
0x15c0   :  { %2194 = vmax.xlane.f32.xlu1 %v2193_v23 }
0x15d1   :  { %2374 = vrot.lane.b32.xlu1 %v640_v24, %s3069_s10  ;;  %2372 = vrot.lane.b32.xlu0 %v639_v61, %s3069_s10 }
0x15d5   :  { %2384 = vrot.lane.b32.xlu1 %v1658_v16, %s3070_s11  ;;  %2376 = vrot.lane.b32.xlu0 %v641_v18, %s3069_s10 }
0x1606   :  { %v2266_v63 = vpop.permute.xlu1 %2265 }
0x1607   :  { %2941 = vmatmul.mubr.msk.f32.vlgmr.msra.gmra.mxu0 %vm64_vm1, %v2266_v63 }
0x1608   :  { %2943 = vmatprep.mubr.msk.f32.mxu0 %vm3062_vm0, %v3061_v0 }
0x160a   :  { %v2268_v12 = vpop.permute.xlu0 %2267 }
0x160b   :  { %2944 = vmatmul.mubr.msk.f32.gmra.mxu0 %vm64_vm1, %v2268_v12 }
0x160c   :  { %2946 = vmatprep.mubr.msk.f32.mxu0 %vm3062_vm0, %v3061_v0 }
0x160e   :  { %v2270_v55 = vpop.permute.xlu1 %2269 }
0x160f   :  { %2947 = vmatmul.mubr.msk.f32.gmra.mxu0 %vm64_vm1, %v2270_v55 }
0x1640   :  { %v2198_v57 = vpop.xlane.xlu0 %2197 }
0x1641   :  { %v2204_v59 = vsub.f32 %v3839_v6, %v2198_v57 }
0x1643   :  { %v2208_v33 = vmul.f32 1.442695, %v2204_v59 }
0x1644   :  { %v2202_v21 = vpop.xlane.xlu0 %2201 }
0x1645   :  { %3049 = vpow2.f32 %v2208_v33  ;;  %v2205_v30 = vsub.f32 %v3842_v7, %v2202_v21 }
0x1647   :  { %v2210_v34 = vmul.f32 1.442695, %v2205_v30 }
0x1648   :  { %v2373_v48 = vpop.permute.xlu0 %2372 }
0x1649   :  { %v2195_v31 = vpop.xlane.xlu1 %2194 }
0x164a   :  { %v2203_v4 = vsub.f32 %v3836_v47, %v2195_v31 }
0x164c   :  { %v2206_v35 = vmul.f32 1.442695, %v2203_v4  ;;  %v2377_v50 = vpop.permute.xlu0 %2376 }
0x164d   :  { %v2375_v46 = vpop.permute.xlu1 %2374 }
0x164e   :  { %3051 = vpow2.f32 %v2206_v35 }
0x164f   :  { %3053 = vpow2.f32 %v2210_v34 }
0x1651   :  { %v2385_v49 = vpop.permute.xlu1 %2384 }
0x1652   :  { %v3050_v36 = vpop.eup %3049 }
0x1653   :  { %v2215_v0 = vsel %vm927_vm7, %v3050_v36, 0.0 }
0x1654   :  { %2216 = vadd.xlane.f32.xlu0 %v2215_v0 }
0x165b   :  { %v3052_v37 = vpop.eup %3051 }
0x165c   :  { %v2212_v38 = vsel %vm927_vm7, %v3052_v37, 0.0  ;;  %v3054_v9 = vpop.eup %3053 }
0x165d   :  { %2213 = vadd.xlane.f32.xlu1 %v2212_v38  ;;  %v2218_v26 = vsel %vm2199_vm8, %v3054_v9, 0.0 }
0x1661   :  { %2219 = vadd.xlane.f32.xlu1 %v2218_v26 }
0x16c7   :  { %v2343_v40 = vpop.f32.mrf.mxu0 }
0x16c8   :  { %v2344_v41 = vadd.f32 %v2513_v39, %v2343_v40 }
0x16c9   :  { %v2942_v42 = vpop.f32.mrf.mxu0 }
0x16ca   :  { %2360 = vrot.lane.b32.xlu0 %v2344_v41, %s3064_s30 }
0x16cb   :  { %v2348_v43 = vpop.f32.mrf.mxu0 }
0x16cc   :  { %v2349_v51 = vadd.f32 %v2513_v39, %v2348_v43 }
0x16cd   :  { %v2945_v52 = vpop.f32.mrf.mxu0 }
0x16ce   :  { %2386 = vrot.lane.b32.xlu0 %v1659_v25, %s3070_s11  ;;  %2362 = vrot.lane.b32.xlu1 %v2349_v51, %s3064_s30 }
0x16cf   :  { %v2353_v53 = vpop.f32.mrf.mxu0 }
0x16d0   :  { %v2354_v44 = vadd.f32 %v2513_v39, %v2353_v53 }
0x16d1   :  { %v2948_v5 = vpop.f32.mrf.mxu0 }
0x16d2   :  { %2364 = vrot.lane.b32.xlu1 %v2354_v44, %s3064_s30 }
0x16d6   :  { %2388 = vrot.lane.b32.xlu1 %v1660_v45, %s3070_s11 }
0x16dd   :  { %v2217_v22 = vpop.xlane.xlu0 %2216 }
0x16e6   :  { %v2214_v54 = vpop.xlane.xlu1 %2213 }
0x16e7   :  { %3055 = vlog2.f32 %v2214_v54 }
0x16e8   :  { %3057 = vlog2.f32 %v2217_v22 }
0x16ea   :  { %v2220_v10 = vpop.xlane.xlu1 %2219 }
0x16eb   :  { %3059 = vlog2.f32 %v2220_v10 }
0x16f4   :  { %v3056_v15 = vpop.eup %3055 }
0x16f5   :  { %v2222_v17 = vmul.f32 0.6931472, %v3056_v15  ;;  %v3058_v56 = vpop.eup %3057 }
0x16f6   :  { %v2224_v58 = vmul.f32 0.6931472, %v3058_v56 }
0x16f7   :  { %v2227_v60 = vadd.f32 %v2222_v17, %v2195_v31 }
0x16f8   :  { %v3060_v62 = vpop.eup %3059  ;;  %v2228_v1 = vadd.f32 %v2224_v58, %v2198_v57 }
0x16f9   :  { %v2226_v32 = vmul.f32 0.6931472, %v3060_v62  ;;  %v2230_v2 = vsub.f32 %v3836_v47, %v2227_v60 }
0x16fa   :  { %v2231_v11 = vsub.f32 %v3839_v6, %v2228_v1 }
0x16fb   :  { %v2229_v19 = vadd.f32 %v2226_v32, %v2202_v21 }
0x16fd   :  { %v2232_v61 = vsub.f32 %v3842_v7, %v2229_v19 }
0x173c   :  { %v2361_v8 = vpop.permute.xlu0 %2360 }
0x173d   :  { %v2393_v20 = vsel %vm927_vm7, %v2230_v2, %v2361_v8 }
0x173e   :  { %v2397_v29 = vsel %vm2396_vm9, %v2393_v20, %v2373_v48 }
0x173f   :  { %v2401_v14 = vsel %vm2400_vm10, %v2397_v29, %v2385_v49 }
0x1740   :  { %v2363_v23 = vpop.permute.xlu1 %2362  ;;  %v2405_v13 = vsel %vm2404_vm11, %v2401_v14, 0.0  ;;  %v2387_v47 = vpop.permute.xlu0 %2386 }
0x1741   :  { %v2394_v27 = vsel %vm927_vm7, %v2231_v11, %v2363_v23  ;;  %2408 = vst [vmem:[%s3922_s13] sm:$0xff] %v2405_v13 }
0x1742   :  { %v2398_v24 = vsel %vm2396_vm9, %v2394_v27, %v2375_v46 }
0x1743   :  { %v2402_v28 = vsel %vm2400_vm10, %v2398_v24, %v2387_v47 }
0x1744   :  { %v2365_v16 = vpop.permute.xlu1 %2364  ;;  %v2406_v6 = vsel %vm2404_vm11, %v2402_v28, 0.0 }
0x1745   :  { %v2395_v18 = vsel %vm927_vm7, %v2232_v61, %v2365_v16  ;;  %2409 = vst [vmem:[%s3922_s13 + $0x8] sm:$0xff] %v2406_v6 }
0x1746   :  { %v2399_v3 = vsel %vm2396_vm9, %v2395_v18, %v2377_v50 }
0x1748   :  { %v2389_v63 = vpop.permute.xlu1 %2388 }
0x1749   :  { %v2403_v12 = vsel %vm2400_vm10, %v2399_v3, %v2389_v63 }
0x174a   :  { %v2407_v55 = vsel %vm2404_vm11, %v2403_v12, 0.0 }
0x174b   :  { %2410 = vst [vmem:[%s3922_s13 + $0x10] sm:$0xf] %v2407_v55 }

</bundles_post_ra>
